<compile_context>
chip_gen: v6e
topology: v6e:2x2x1
jax: 0.10.0
libtpu: 0.0.40
codegen_flags: <defaults>
</compile_context>

<pallas_src>
import functools

import jax
import jax.numpy as jnp
from jax.experimental import pallas as pl
from jax.experimental.pallas import tpu as pltpu


# ---------------------------------------------------------------------------
# Kernels
# ---------------------------------------------------------------------------

def _upsample_kernel_dense(x_ref, o_ref, *, s):
    """x_ref: (b, H, W) -> o_ref: (b, H, s*W*s), lane-dense.

    o_ref[p, h] viewed as (s, W*s) is s identical copies of repeat(x[p, h], s):
    width replication is a lane-dim interleave (jnp.repeat), height replication
    is a lane-dim concat -- no sublane interleave, no tiny trailing dims.
    """
    x = x_ref[...]                                    # (b, H, W)
    row = jnp.repeat(x, s, axis=-1)                   # (b, H, W*s)
    o_ref[...] = jnp.concatenate([row] * s, axis=-1)  # (b, H, s*W*s)


def _upsample_kernel_bcast(x_ref, o_ref):
    """Fallback: x_ref (b, H, 1, W, 1) -> o_ref (b, H, s, W, s) via broadcast."""
    o_ref[...] = jnp.broadcast_to(x_ref[...], o_ref.shape)


# ---------------------------------------------------------------------------
# Hardware-aware budgets & tiling helpers
# ---------------------------------------------------------------------------

def _ceil_to(x, m):
    return -(-x // m) * m


@functools.lru_cache(maxsize=None)
def _hw_info():
    """(vmem_capacity_bytes, tensorcores_per_chip) with conservative defaults."""
    vmem = 64 * 1024 * 1024      # smallest across v5e/v6e/v7x
    cores = 1
    try:
        vmem = int(pltpu.get_tpu_info().vmem_capacity_bytes)
    except Exception:
        pass
    try:
        kind = jax.devices()[0].device_kind.lower()
        if "v7" in kind:
            cores = 2            # v7x: two TensorCores share the 'parallel' grid
    except Exception:
        pass
    return vmem, cores


def _budgets():
    vmem, cores = _hw_info()
    # ~96 MiB limit / ~24 MiB per step on 128 MiB parts (v5e/v6e),
    # ~48 MiB limit / ~12 MiB per step on 64 MiB parts (v7x).
    vmem_limit = int(min(96 << 20, max(32 << 20, (3 * vmem) // 4)))
    step_budget = vmem_limit // 4    # double-buffered (in + out) with 2x slack
    return vmem_limit, step_budget, cores


def _choose_block_planes(num_planes, in_plane_pad, out_plane_pad, step_budget, cores):
    """Planes (N*C) fused per grid step, sized by padded VMEM footprint."""
    per_plane = max(1, in_plane_pad + out_plane_pad)
    b = max(1, min(num_planes, step_budget // per_plane))
    if cores > 1 and num_planes >= 2:
        # v7x megacore: aim for >= ~8 grid steps (>= ~4 per TensorCore) so the
        # output writeback of step i overlaps the fetch of step i+1 per core.
        # Single-TC chips (v5e/v6e) keep the largest block instead.
        b = max(1, min(b, num_planes // min(8, num_planes)))
    if num_planes % b:
        # Prefer a nearby exact divisor (no ragged tail) but never shrink the
        # block by more than 2x -- otherwise accept a ragged last block.
        for d in range(b, max(1, b // 2) - 1, -1):
            if num_planes % d == 0:
                return d
    return b


def _cost(x3, s):
    nbytes = x3.size * x3.dtype.itemsize
    return pl.CostEstimate(flops=0, transcendentals=0,
                           bytes_accessed=(1 + s * s) * nbytes)


# ---------------------------------------------------------------------------
# pallas_call wrappers
# ---------------------------------------------------------------------------

def _upsample_planes_dense(x3, s):
    """(NC, H, W) -> (NC, H, s*W*s) lane-dense nearest upsample."""
    NC, H, W = x3.shape
    isz = x3.dtype.itemsize
    Wo = s * W * s
    vmem_limit, step_budget, cores = _budgets()
    in_plane = _ceil_to(H, 8) * _ceil_to(W, 128) * isz
    out_plane = _ceil_to(H, 8) * _ceil_to(Wo, 128) * isz
    b = _choose_block_planes(NC, in_plane, out_plane, step_budget, cores)
    return pl.pallas_call(
        functools.partial(_upsample_kernel_dense, s=s),
        out_shape=jax.ShapeDtypeStruct((NC, H, Wo), x3.dtype),
        grid_spec=pltpu.PrefetchScalarGridSpec(
            num_scalar_prefetch=0,
            grid=(pl.cdiv(NC, b),),
            # tunable: pipeline_mode=pl.Buffered(3) on the input spec (input is
            # s^2 smaller than the output) -- sweep on hardware before enabling.
            in_specs=[pl.BlockSpec((b, H, W), lambda n: (n, 0, 0))],
            out_specs=pl.BlockSpec((b, H, Wo), lambda n: (n, 0, 0)),
        ),
        compiler_params=pltpu.CompilerParams(
            dimension_semantics=("parallel",),
            vmem_limit_bytes=vmem_limit,
        ),
        cost_estimate=_cost(x3, s),
    )(x3)


def _upsample_planes_bcast(x3, s):
    """Fallback (broadcast-only, guaranteed lowering; lane dim pads to 128)."""
    NC, H, W = x3.shape
    isz = x3.dtype.itemsize
    vmem_limit, step_budget, cores = _budgets()
    in_plane = H * _ceil_to(W, 8) * 128 * isz
    out_plane = H * s * _ceil_to(W, 8) * 128 * isz
    b = _choose_block_planes(NC, in_plane, out_plane, step_budget, cores)
    x5 = x3.reshape(NC, H, 1, W, 1)
    out5 = pl.pallas_call(
        _upsample_kernel_bcast,
        out_shape=jax.ShapeDtypeStruct((NC, H, s, W, s), x3.dtype),
        grid_spec=pltpu.PrefetchScalarGridSpec(
            num_scalar_prefetch=0,
            grid=(pl.cdiv(NC, b),),
            in_specs=[pl.BlockSpec((b, H, 1, W, 1), lambda n: (n, 0, 0, 0, 0))],
            out_specs=pl.BlockSpec((b, H, s, W, s), lambda n: (n, 0, 0, 0, 0)),
        ),
        compiler_params=pltpu.CompilerParams(
            dimension_semantics=("parallel",),
            vmem_limit_bytes=vmem_limit,
        ),
        cost_estimate=_cost(x3, s),
    )(x5)
    return out5.reshape(NC, H * s, W * s)


@functools.lru_cache(maxsize=None)
def _dense_path_supported(nc, h, w, dtype_name, s):
    """Per-(shape, dtype, s) cached AOT lowering/compile check.

    No execution, no block_until_ready -- safe under an enclosing jax.jit, and a
    failure for one signature never pins other signatures to the slow fallback.
    """
    try:
        shape = jax.ShapeDtypeStruct((nc, h, w), jnp.dtype(dtype_name))
        jax.jit(lambda a: _upsample_planes_dense(a, s)).lower(shape).compile()
        return True
    except Exception:
        return False


def upsample_nearest(x, scale_factor):
    """Nearest-neighbor upsample of an NCHW array by an integer scale factor."""
    s = int(scale_factor)
    # TODO(synk): non-integer / fractional scale_factor (floor(i/scale) index
    # gather) is not supported.
    assert s == scale_factor and s >= 1, "only positive integer scale_factor supported"
    if s == 1:
        return x
    N, C, H, W = x.shape
    x3 = x.reshape(N * C, H, W)
    if _dense_path_supported(N * C, H, W, jnp.dtype(x.dtype).name, s):
        y3 = _upsample_planes_dense(x3, s)   # (NC, H, s*W*s)
    else:
        y3 = _upsample_planes_bcast(x3, s)   # (NC, H*s, W*s)
    # Both layouts flatten in exactly nearest-neighbor order:
    #   out[n, c, h*s + i, w*s + j] == x[n, c, h, w]
    return y3.reshape(N, C, H * s, W * s)


class Upsample:
    """JAX/Pallas equivalent of the PyTorch Upsample module (nearest mode)."""

    def __init__(self, scale_factor, mode="nearest"):
        assert mode == "nearest", "only 'nearest' mode is implemented"
        self.scale_factor = scale_factor
        self.mode = mode

    def __call__(self, x):
        return upsample_nearest(x, self.scale_factor)


if __name__ == "__main__":
    key = jax.random.PRNGKey(0)
    k1, k2 = jax.random.split(key)

    # NCHW input, small shapes: batch=2, channels=4, spatial=16, scale 2.
    x = jax.random.normal(k1, (2, 4, 16, 16), dtype=jnp.float32)
    model = Upsample(scale_factor=2, mode="nearest")
    y = jax.block_until_ready(model(x))

    ref = jnp.repeat(jnp.repeat(x, 2, axis=2), 2, axis=3)
    assert y.shape == (2, 4, 32, 32), y.shape
    assert y.dtype == x.dtype
    assert bool(jnp.array_equal(y, ref)), "mismatch vs reference nearest upsample"

    # YOLO-ish odd spatial size and a different scale factor.
    x2 = jax.random.normal(k2, (1, 3, 13, 13), dtype=jnp.float32)
    y2 = jax.block_until_ready(Upsample(scale_factor=3)(x2))
    ref2 = jnp.repeat(jnp.repeat(x2, 3, axis=2), 3, axis=3)
    assert y2.shape == (1, 3, 39, 39), y2.shape
    assert bool(jnp.array_equal(y2, ref2)), "mismatch vs reference (s=3)"

    print("KERNEL_OK")
</pallas_src>

<mosaic_0001>
module attributes {stable_mosaic.version = 11 : i64} {
  func.func @_upsample_kernel_bcast(%arg0: i32, %arg1: memref<8x16x1x16x1xf32, #tpu.memory_space<vmem>>, %arg2: memref<8x16x2x16x2xf32, #tpu.memory_space<vmem>>) attributes {dimension_semantics = [#tpu.dimension_semantics<parallel>], iteration_bounds = array<i64: 1>, scalar_prefetch = 0 : i64, scratch_operands = 0 : i64, tpu.core_type = #tpu.core_type<tc>, window_params = [{transform_indices = @transform_0, window_bounds = array<i64: 8, 16, 1, 16, 1>}, {transform_indices = @transform_1, window_bounds = array<i64: 8, 16, 2, 16, 2>}]} {
    %c0 = arith.constant 0 : index
    %c0_0 = arith.constant 0 : index
    %c0_1 = arith.constant 0 : index
    %c0_2 = arith.constant 0 : index
    %c0_3 = arith.constant 0 : index
    %0 = vector.load %arg1[%c0, %c0_0, %c0_1, %c0_2, %c0_3] : memref<8x16x1x16x1xf32, #tpu.memory_space<vmem>>, vector<8x16x1x16x1xf32>
    %1 = vector.shape_cast %0 : vector<8x16x1x16x1xf32> to vector<8x16x1x16x1xf32>
    %2 = vector.broadcast %1 : vector<8x16x1x16x1xf32> to vector<8x16x2x16x2xf32>
    %c0_4 = arith.constant 0 : index
    %c0_5 = arith.constant 0 : index
    %c0_6 = arith.constant 0 : index
    %c0_7 = arith.constant 0 : index
    %c0_8 = arith.constant 0 : index
    %3 = vector.load %arg2[%c0_4, %c0_5, %c0_6, %c0_7, %c0_8] : memref<8x16x2x16x2xf32, #tpu.memory_space<vmem>>, vector<8x16x2x16x2xf32>
    tpu.vector_store %arg2[%c0_4, %c0_5, %c0_6, %c0_7, %c0_8], %2 {strides = array<i32>} : memref<8x16x2x16x2xf32, #tpu.memory_space<vmem>>, vector<8x16x2x16x2xf32>,
    return
  }
  func.func @transform_0(%arg0: i32) -> (i32, i32, i32, i32, i32) {
    %c0_i32 = arith.constant 0 : i32
    %c0_i32_0 = arith.constant 0 : i32
    %c0_i32_1 = arith.constant 0 : i32
    %c0_i32_2 = arith.constant 0 : i32
    %c0_i32_3 = arith.constant 0 : i32
    return %arg0, %c0_i32, %c0_i32_0, %c0_i32_1, %c0_i32_2 : i32, i32, i32, i32, i32
  }
  func.func @transform_1(%arg0: i32) -> (i32, i32, i32, i32, i32) {
    %c0_i32 = arith.constant 0 : i32
    %c0_i32_0 = arith.constant 0 : i32
    %c0_i32_1 = arith.constant 0 : i32
    %c0_i32_2 = arith.constant 0 : i32
    %c0_i32_3 = arith.constant 0 : i32
    return %arg0, %c0_i32, %c0_i32_0, %c0_i32_1, %c0_i32_2 : i32, i32, i32, i32, i32
  }
}

</mosaic_0001>

<bundles_post_ra>
// kernel: tpu_custom_call.1
= control target key start
LH: loop header
LB: loop body
LE: loop exit
PB: predicated region body
PF: predicated region fallthrough
CT: control target
= control target key end

     0   :  { %v2064_v0 = vmov 0   ;;  %vm1544_vm0 = vcmask 15360   ;;  %s4891_s0 = inlined_call_operand.vmem [shape: f32[8,16,1,16,1], index: 0, kind: input, shape index: {}]   ;;  %s4892_s1 = inlined_call_operand.vmem [shape: f32[8,16,2,16,2], index: 1, kind: output, shape index: {}]  }
   0x1   :  { %2063 = vset.pattern.permute.xlu1 %v2064_v0  ;;  %2062 = vset.pattern.permute.xlu0 %v2064_v0  ;;  %v10_v1 = vld [vmem:[%s4891_s0 + $0x10] sm:$0xff]  ;;  %v8_v2 = vld [vmem:[%s4891_s0] sm:$0xff]  ;;  %v11_v3 = vld [vmem:[%s4891_s0 + $0x18] sm:$0xff] }
   0x2   :  { %276 = vperm.xlu1 %2063, %v10_v1   ;;  %266 = vperm.xlu0 %2062, %v8_v2   ;;  %v9_v4 = vld [vmem:[%s4891_s0 + $0x8] sm:$0xff]  ;;  %v12_v6 = vld [vmem:[%s4891_s0 + $0x20] sm:$0xff]  ;;  %v15_v7 = vld [vmem:[%s4891_s0 + $0x38] sm:$0xff] }
   0x3   :  { %v13_v5 = vld [vmem:[%s4891_s0 + $0x28] sm:$0xff]  ;;  %v14_v8 = vld [vmem:[%s4891_s0 + $0x30] sm:$0xff]  ;;  %v16_v10 = vld [vmem:[%s4891_s0 + $0x40] sm:$0xff] }
   0x4   :  { %v17_v9 = vld [vmem:[%s4891_s0 + $0x48] sm:$0xff]  ;;  %v19_v11 = vld [vmem:[%s4891_s0 + $0x58] sm:$0xff]  ;;  %v18_v12 = vld [vmem:[%s4891_s0 + $0x50] sm:$0xff] }
   0x5   :  { %v21_v13 = vld [vmem:[%s4891_s0 + $0x68] sm:$0xff]  ;;  %v20_v14 = vld [vmem:[%s4891_s0 + $0x60] sm:$0xff]  ;;  %v23_v15 = vld [vmem:[%s4891_s0 + $0x78] sm:$0xff] }
   0x6   :  { %281 = vperm.xlu1 %2063, %v11_v3   ;;  %271 = vperm.xlu0 %2062, %v9_v4   ;;  %v22_v16 = vld [vmem:[%s4891_s0 + $0x70] sm:$0xff]  ;;  %v25_v17 = vld [vmem:[%s4891_s0 + $0x88] sm:$0xff]  ;;  %v24_v18 = vld [vmem:[%s4891_s0 + $0x80] sm:$0xff] }
   0x7   :  { %v27_v19 = vld [vmem:[%s4891_s0 + $0x98] sm:$0xff]  ;;  %v26_v20 = vld [vmem:[%s4891_s0 + $0x90] sm:$0xff]  ;;  %v29_v21 = vld [vmem:[%s4891_s0 + $0xa8] sm:$0xff] }
   0x8   :  { %v28_v22 = vld [vmem:[%s4891_s0 + $0xa0] sm:$0xff]  ;;  %v31_v23 = vld [vmem:[%s4891_s0 + $0xb8] sm:$0xff]  ;;  %v30_v24 = vld [vmem:[%s4891_s0 + $0xb0] sm:$0xff] }
   0x9   :  { %v33_v25 = vld [vmem:[%s4891_s0 + $0xc8] sm:$0xff]  ;;  %v32_v26 = vld [vmem:[%s4891_s0 + $0xc0] sm:$0xff]  ;;  %v35_v27 = vld [vmem:[%s4891_s0 + $0xd8] sm:$0xff] }
   0xa   :  { %291 = vperm.xlu1 %2063, %v13_v5   ;;  %286 = vperm.xlu0 %2062, %v12_v6   ;;  %v34_v28 = vld [vmem:[%s4891_s0 + $0xd0] sm:$0xff]  ;;  %v37_v29 = vld [vmem:[%s4891_s0 + $0xe8] sm:$0xff]  ;;  %v36_v30 = vld [vmem:[%s4891_s0 + $0xe0] sm:$0xff] }
   0xb   :  { %v39_v31 = vld [vmem:[%s4891_s0 + $0xf8] sm:$0xff]  ;;  %v38_v32 = vld [vmem:[%s4891_s0 + $0xf0] sm:$0xff]  ;;  %v41_v33 = vld [vmem:[%s4891_s0 + $0x108] sm:$0xff] }
   0xc   :  { %v40_v34 = vld [vmem:[%s4891_s0 + $0x100] sm:$0xff]  ;;  %v43_v35 = vld [vmem:[%s4891_s0 + $0x118] sm:$0xff]  ;;  %v42_v36 = vld [vmem:[%s4891_s0 + $0x110] sm:$0xff] }
   0xd   :  { %v45_v37 = vld [vmem:[%s4891_s0 + $0x128] sm:$0xff]  ;;  %v44_v38 = vld [vmem:[%s4891_s0 + $0x120] sm:$0xff]  ;;  %v47_v39 = vld [vmem:[%s4891_s0 + $0x138] sm:$0xff] }
   0xe   :  { %301 = vperm.xlu1 %2063, %v15_v7   ;;  %296 = vperm.xlu0 %2062, %v14_v8   ;;  %v46_v40 = vld [vmem:[%s4891_s0 + $0x130] sm:$0xff]  ;;  %v49_v41 = vld [vmem:[%s4891_s0 + $0x148] sm:$0xff]  ;;  %v48_v42 = vld [vmem:[%s4891_s0 + $0x140] sm:$0xff] }
   0xf   :  { %v51_v43 = vld [vmem:[%s4891_s0 + $0x158] sm:$0xff]  ;;  %v50_v44 = vld [vmem:[%s4891_s0 + $0x150] sm:$0xff]  ;;  %v53_v45 = vld [vmem:[%s4891_s0 + $0x168] sm:$0xff] }
  0x10   :  { %v52_v46 = vld [vmem:[%s4891_s0 + $0x160] sm:$0xff]  ;;  %v55_v47 = vld [vmem:[%s4891_s0 + $0x178] sm:$0xff]  ;;  %v54_v48 = vld [vmem:[%s4891_s0 + $0x170] sm:$0xff] }
  0x11   :  { %v57_v49 = vld [vmem:[%s4891_s0 + $0x188] sm:$0xff]  ;;  %v56_v50 = vld [vmem:[%s4891_s0 + $0x180] sm:$0xff]  ;;  %v59_v51 = vld [vmem:[%s4891_s0 + $0x198] sm:$0xff] }
  0x12   :  { %311 = vperm.xlu1 %2063, %v17_v9   ;;  %306 = vperm.xlu0 %2062, %v16_v10   ;;  %v58_v52 = vld [vmem:[%s4891_s0 + $0x190] sm:$0xff]  ;;  %v61_v53 = vld [vmem:[%s4891_s0 + $0x1a8] sm:$0xff]  ;;  %v60_v54 = vld [vmem:[%s4891_s0 + $0x1a0] sm:$0xff] }
  0x13   :  { %v63_v55 = vld [vmem:[%s4891_s0 + $0x1b8] sm:$0xff]  ;;  %v62_v56 = vld [vmem:[%s4891_s0 + $0x1b0] sm:$0xff]  ;;  %v65_v57 = vld [vmem:[%s4891_s0 + $0x1c8] sm:$0xff] }
  0x14   :  { %v64_v58 = vld [vmem:[%s4891_s0 + $0x1c0] sm:$0xff]  ;;  %v67_v59 = vld [vmem:[%s4891_s0 + $0x1d8] sm:$0xff]  ;;  %v66_v60 = vld [vmem:[%s4891_s0 + $0x1d0] sm:$0xff] }
  0x15   :  { %v69_v61 = vld [vmem:[%s4891_s0 + $0x1e8] sm:$0xff]  ;;  %v68_v62 = vld [vmem:[%s4891_s0 + $0x1e0] sm:$0xff]  ;;  %v71_v63 = vld [vmem:[%s4891_s0 + $0x1f8] sm:$0xff] }
  0x16   :  { %321 = vperm.xlu1 %2063, %v19_v11   ;;  %316 = vperm.xlu0 %2062, %v18_v12   ;;  %v70_v0 = vld [vmem:[%s4891_s0 + $0x1f0] sm:$0xff]  ;;  %v73_v3 = vld [vmem:[%s4891_s0 + $0x208] sm:$0xff]  ;;  %v72_v4 = vld [vmem:[%s4891_s0 + $0x200] sm:$0xff] }
  0x17   :  { %v75_v7 = vld [vmem:[%s4891_s0 + $0x218] sm:$0xff]  ;;  %v74_v8 = vld [vmem:[%s4891_s0 + $0x210] sm:$0xff]  ;;  %v77_v11 = vld [vmem:[%s4891_s0 + $0x228] sm:$0xff] }
  0x18   :  { %v76_v12 = vld [vmem:[%s4891_s0 + $0x220] sm:$0xff] }
  0x1a   :  { %331 = vperm.xlu1 %2063, %v21_v13   ;;  %326 = vperm.xlu0 %2062, %v20_v14  }
  0x1e   :  { %341 = vperm.xlu1 %2063, %v23_v15   ;;  %336 = vperm.xlu0 %2062, %v22_v16   ;;  %v79_v15 = vld [vmem:[%s4891_s0 + $0x238] sm:$0xff]  ;;  %v78_v16 = vld [vmem:[%s4891_s0 + $0x230] sm:$0xff] }
  0x22   :  { %351 = vperm.xlu1 %2063, %v25_v17   ;;  %346 = vperm.xlu0 %2062, %v24_v18  }
  0x26   :  { %361 = vperm.xlu1 %2063, %v27_v19   ;;  %356 = vperm.xlu0 %2062, %v26_v20   ;;  %v81_v19 = vld [vmem:[%s4891_s0 + $0x248] sm:$0xff]  ;;  %v80_v20 = vld [vmem:[%s4891_s0 + $0x240] sm:$0xff] }
  0x2a   :  { %371 = vperm.xlu1 %2063, %v29_v21   ;;  %366 = vperm.xlu0 %2062, %v28_v22  }
  0x2e   :  { %381 = vperm.xlu1 %2063, %v31_v23   ;;  %376 = vperm.xlu0 %2062, %v30_v24   ;;  %v83_v23 = vld [vmem:[%s4891_s0 + $0x258] sm:$0xff]  ;;  %v82_v24 = vld [vmem:[%s4891_s0 + $0x250] sm:$0xff] }
  0x32   :  { %391 = vperm.xlu1 %2063, %v33_v25   ;;  %386 = vperm.xlu0 %2062, %v32_v26  }
  0x36   :  { %401 = vperm.xlu1 %2063, %v35_v27   ;;  %396 = vperm.xlu0 %2062, %v34_v28   ;;  %v85_v27 = vld [vmem:[%s4891_s0 + $0x268] sm:$0xff]  ;;  %v84_v28 = vld [vmem:[%s4891_s0 + $0x260] sm:$0xff] }
  0x3a   :  { %411 = vperm.xlu1 %2063, %v37_v29   ;;  %406 = vperm.xlu0 %2062, %v36_v30  }
  0x3e   :  { %421 = vperm.xlu1 %2063, %v39_v31   ;;  %416 = vperm.xlu0 %2062, %v38_v32   ;;  %v87_v31 = vld [vmem:[%s4891_s0 + $0x278] sm:$0xff]  ;;  %v86_v32 = vld [vmem:[%s4891_s0 + $0x270] sm:$0xff] }
  0x42   :  { %431 = vperm.xlu1 %2063, %v41_v33   ;;  %426 = vperm.xlu0 %2062, %v40_v34  }
  0x46   :  { %441 = vperm.xlu1 %2063, %v43_v35   ;;  %436 = vperm.xlu0 %2062, %v42_v36   ;;  %v89_v35 = vld [vmem:[%s4891_s0 + $0x288] sm:$0xff]  ;;  %v88_v36 = vld [vmem:[%s4891_s0 + $0x280] sm:$0xff] }
  0x4a   :  { %451 = vperm.xlu1 %2063, %v45_v37   ;;  %446 = vperm.xlu0 %2062, %v44_v38  }
  0x4e   :  { %461 = vperm.xlu1 %2063, %v47_v39   ;;  %456 = vperm.xlu0 %2062, %v46_v40   ;;  %v91_v39 = vld [vmem:[%s4891_s0 + $0x298] sm:$0xff]  ;;  %v90_v40 = vld [vmem:[%s4891_s0 + $0x290] sm:$0xff] }
  0x52   :  { %471 = vperm.xlu1 %2063, %v49_v41   ;;  %466 = vperm.xlu0 %2062, %v48_v42  }
  0x56   :  { %481 = vperm.xlu1 %2063, %v51_v43   ;;  %476 = vperm.xlu0 %2062, %v50_v44   ;;  %v93_v43 = vld [vmem:[%s4891_s0 + $0x2a8] sm:$0xff]  ;;  %v92_v44 = vld [vmem:[%s4891_s0 + $0x2a0] sm:$0xff] }
  0x5a   :  { %491 = vperm.xlu1 %2063, %v53_v45   ;;  %486 = vperm.xlu0 %2062, %v52_v46  }
  0x5e   :  { %501 = vperm.xlu1 %2063, %v55_v47   ;;  %496 = vperm.xlu0 %2062, %v54_v48   ;;  %v95_v47 = vld [vmem:[%s4891_s0 + $0x2b8] sm:$0xff]  ;;  %v94_v48 = vld [vmem:[%s4891_s0 + $0x2b0] sm:$0xff] }
  0x62   :  { %511 = vperm.xlu1 %2063, %v57_v49   ;;  %506 = vperm.xlu0 %2062, %v56_v50  }
  0x66   :  { %521 = vperm.xlu1 %2063, %v59_v51   ;;  %516 = vperm.xlu0 %2062, %v58_v52   ;;  %v97_v51 = vld [vmem:[%s4891_s0 + $0x2c8] sm:$0xff]  ;;  %v96_v52 = vld [vmem:[%s4891_s0 + $0x2c0] sm:$0xff] }
  0x6a   :  { %531 = vperm.xlu1 %2063, %v61_v53   ;;  %526 = vperm.xlu0 %2062, %v60_v54  }
  0x6e   :  { %541 = vperm.xlu1 %2063, %v63_v55   ;;  %536 = vperm.xlu0 %2062, %v62_v56   ;;  %v99_v55 = vld [vmem:[%s4891_s0 + $0x2d8] sm:$0xff]  ;;  %v98_v56 = vld [vmem:[%s4891_s0 + $0x2d0] sm:$0xff] }
  0x72   :  { %551 = vperm.xlu1 %2063, %v65_v57   ;;  %546 = vperm.xlu0 %2062, %v64_v58  }
  0x76   :  { %561 = vperm.xlu1 %2063, %v67_v59   ;;  %556 = vperm.xlu0 %2062, %v66_v60   ;;  %v101_v59 = vld [vmem:[%s4891_s0 + $0x2e8] sm:$0xff]  ;;  %v100_v60 = vld [vmem:[%s4891_s0 + $0x2e0] sm:$0xff] }
  0x7a   :  { %571 = vperm.xlu1 %2063, %v69_v61   ;;  %566 = vperm.xlu0 %2062, %v68_v62  }
  0x7d   :  { %v277_v1 = vpop.permute.xlu1 %276  ;;  %v267_v2 = vpop.permute.xlu0 %266 }
  0x7e   :  { %1549 = vst.msk [vmem:[%s4892_s1 + $0x20] sm:$0xff] %vm1544_vm0, %v277_v1  ;;  %1551 = vst.msk [vmem:[%s4892_s1 + $0x30] sm:$0xff] %vm1544_vm0, %v277_v1  ;;  %581 = vperm.xlu1 %2063, %v71_v63   ;;  %576 = vperm.xlu0 %2062, %v70_v0   ;;  %v103_v63 = vld [vmem:[%s4891_s0 + $0x2f8] sm:$0xff]  ;;  %v102_v0 = vld [vmem:[%s4891_s0 + $0x2f0] sm:$0xff] }
  0x7f   :  { %1545 = vst.msk [vmem:[%s4892_s1] sm:$0xff] %vm1544_vm0, %v267_v2  ;;  %1547 = vst.msk [vmem:[%s4892_s1 + $0x10] sm:$0xff] %vm1544_vm0, %v267_v2 }
  0x81   :  { %v282_v5 = vpop.permute.xlu1 %281  ;;  %v272_v6 = vpop.permute.xlu0 %271 }
  0x82   :  { %1550 = vst.msk [vmem:[%s4892_s1 + $0x28] sm:$0xff] %vm1544_vm0, %v282_v5  ;;  %1552 = vst.msk [vmem:[%s4892_s1 + $0x38] sm:$0xff] %vm1544_vm0, %v282_v5  ;;  %591 = vperm.xlu1 %2063, %v73_v3   ;;  %586 = vperm.xlu0 %2062, %v72_v4   ;;  %v105_v3 = vld [vmem:[%s4891_s0 + $0x308] sm:$0xff]  ;;  %v104_v4 = vld [vmem:[%s4891_s0 + $0x300] sm:$0xff] }
  0x83   :  { %1546 = vst.msk [vmem:[%s4892_s1 + $0x8] sm:$0xff] %vm1544_vm0, %v272_v6  ;;  %1548 = vst.msk [vmem:[%s4892_s1 + $0x18] sm:$0xff] %vm1544_vm0, %v272_v6 }
  0x85   :  { %v292_v9 = vpop.permute.xlu1 %291  ;;  %v287_v10 = vpop.permute.xlu0 %286 }
  0x86   :  { %1554 = vst.msk [vmem:[%s4892_s1 + $0x48] sm:$0xff] %vm1544_vm0, %v292_v9  ;;  %1556 = vst.msk [vmem:[%s4892_s1 + $0x58] sm:$0xff] %vm1544_vm0, %v292_v9  ;;  %601 = vperm.xlu1 %2063, %v75_v7   ;;  %596 = vperm.xlu0 %2062, %v74_v8   ;;  %v107_v7 = vld [vmem:[%s4891_s0 + $0x318] sm:$0xff]  ;;  %v106_v8 = vld [vmem:[%s4891_s0 + $0x310] sm:$0xff] }
  0x87   :  { %1553 = vst.msk [vmem:[%s4892_s1 + $0x40] sm:$0xff] %vm1544_vm0, %v287_v10  ;;  %1555 = vst.msk [vmem:[%s4892_s1 + $0x50] sm:$0xff] %vm1544_vm0, %v287_v10 }
  0x89   :  { %v302_v13 = vpop.permute.xlu1 %301  ;;  %v297_v14 = vpop.permute.xlu0 %296 }
  0x8a   :  { %1558 = vst.msk [vmem:[%s4892_s1 + $0x68] sm:$0xff] %vm1544_vm0, %v302_v13  ;;  %1560 = vst.msk [vmem:[%s4892_s1 + $0x78] sm:$0xff] %vm1544_vm0, %v302_v13  ;;  %611 = vperm.xlu1 %2063, %v77_v11   ;;  %606 = vperm.xlu0 %2062, %v76_v12   ;;  %v109_v11 = vld [vmem:[%s4891_s0 + $0x328] sm:$0xff]  ;;  %v108_v12 = vld [vmem:[%s4891_s0 + $0x320] sm:$0xff] }
  0x8b   :  { %1557 = vst.msk [vmem:[%s4892_s1 + $0x60] sm:$0xff] %vm1544_vm0, %v297_v14  ;;  %1559 = vst.msk [vmem:[%s4892_s1 + $0x70] sm:$0xff] %vm1544_vm0, %v297_v14 }
  0x8d   :  { %v312_v17 = vpop.permute.xlu1 %311  ;;  %v307_v18 = vpop.permute.xlu0 %306 }
  0x8e   :  { %1562 = vst.msk [vmem:[%s4892_s1 + $0x88] sm:$0xff] %vm1544_vm0, %v312_v17  ;;  %1564 = vst.msk [vmem:[%s4892_s1 + $0x98] sm:$0xff] %vm1544_vm0, %v312_v17  ;;  %621 = vperm.xlu1 %2063, %v79_v15   ;;  %616 = vperm.xlu0 %2062, %v78_v16   ;;  %v111_v15 = vld [vmem:[%s4891_s0 + $0x338] sm:$0xff]  ;;  %v110_v16 = vld [vmem:[%s4891_s0 + $0x330] sm:$0xff] }
  0x8f   :  { %1561 = vst.msk [vmem:[%s4892_s1 + $0x80] sm:$0xff] %vm1544_vm0, %v307_v18  ;;  %1563 = vst.msk [vmem:[%s4892_s1 + $0x90] sm:$0xff] %vm1544_vm0, %v307_v18 }
  0x91   :  { %v322_v21 = vpop.permute.xlu1 %321  ;;  %v317_v22 = vpop.permute.xlu0 %316 }
  0x92   :  { %1566 = vst.msk [vmem:[%s4892_s1 + $0xa8] sm:$0xff] %vm1544_vm0, %v322_v21  ;;  %1568 = vst.msk [vmem:[%s4892_s1 + $0xb8] sm:$0xff] %vm1544_vm0, %v322_v21  ;;  %631 = vperm.xlu1 %2063, %v81_v19   ;;  %626 = vperm.xlu0 %2062, %v80_v20   ;;  %v113_v19 = vld [vmem:[%s4891_s0 + $0x348] sm:$0xff]  ;;  %v112_v20 = vld [vmem:[%s4891_s0 + $0x340] sm:$0xff] }
  0x93   :  { %1565 = vst.msk [vmem:[%s4892_s1 + $0xa0] sm:$0xff] %vm1544_vm0, %v317_v22  ;;  %1567 = vst.msk [vmem:[%s4892_s1 + $0xb0] sm:$0xff] %vm1544_vm0, %v317_v22 }
  0x95   :  { %v332_v25 = vpop.permute.xlu1 %331  ;;  %v327_v26 = vpop.permute.xlu0 %326 }
  0x96   :  { %1570 = vst.msk [vmem:[%s4892_s1 + $0xc8] sm:$0xff] %vm1544_vm0, %v332_v25  ;;  %1572 = vst.msk [vmem:[%s4892_s1 + $0xd8] sm:$0xff] %vm1544_vm0, %v332_v25  ;;  %641 = vperm.xlu1 %2063, %v83_v23   ;;  %636 = vperm.xlu0 %2062, %v82_v24   ;;  %v115_v23 = vld [vmem:[%s4891_s0 + $0x358] sm:$0xff]  ;;  %v114_v24 = vld [vmem:[%s4891_s0 + $0x350] sm:$0xff] }
  0x97   :  { %1569 = vst.msk [vmem:[%s4892_s1 + $0xc0] sm:$0xff] %vm1544_vm0, %v327_v26  ;;  %1571 = vst.msk [vmem:[%s4892_s1 + $0xd0] sm:$0xff] %vm1544_vm0, %v327_v26 }
  0x99   :  { %v342_v29 = vpop.permute.xlu1 %341  ;;  %v337_v30 = vpop.permute.xlu0 %336 }
  0x9a   :  { %1574 = vst.msk [vmem:[%s4892_s1 + $0xe8] sm:$0xff] %vm1544_vm0, %v342_v29  ;;  %1576 = vst.msk [vmem:[%s4892_s1 + $0xf8] sm:$0xff] %vm1544_vm0, %v342_v29  ;;  %651 = vperm.xlu1 %2063, %v85_v27   ;;  %646 = vperm.xlu0 %2062, %v84_v28   ;;  %v117_v27 = vld [vmem:[%s4891_s0 + $0x368] sm:$0xff]  ;;  %v116_v28 = vld [vmem:[%s4891_s0 + $0x360] sm:$0xff] }
  0x9b   :  { %1573 = vst.msk [vmem:[%s4892_s1 + $0xe0] sm:$0xff] %vm1544_vm0, %v337_v30  ;;  %1575 = vst.msk [vmem:[%s4892_s1 + $0xf0] sm:$0xff] %vm1544_vm0, %v337_v30 }
  0x9d   :  { %v352_v33 = vpop.permute.xlu1 %351  ;;  %v347_v34 = vpop.permute.xlu0 %346 }
  0x9e   :  { %1578 = vst.msk [vmem:[%s4892_s1 + $0x108] sm:$0xff] %vm1544_vm0, %v352_v33  ;;  %1580 = vst.msk [vmem:[%s4892_s1 + $0x118] sm:$0xff] %vm1544_vm0, %v352_v33  ;;  %661 = vperm.xlu1 %2063, %v87_v31   ;;  %656 = vperm.xlu0 %2062, %v86_v32   ;;  %v119_v31 = vld [vmem:[%s4891_s0 + $0x378] sm:$0xff]  ;;  %v118_v32 = vld [vmem:[%s4891_s0 + $0x370] sm:$0xff] }
  0x9f   :  { %1577 = vst.msk [vmem:[%s4892_s1 + $0x100] sm:$0xff] %vm1544_vm0, %v347_v34  ;;  %1579 = vst.msk [vmem:[%s4892_s1 + $0x110] sm:$0xff] %vm1544_vm0, %v347_v34 }
  0xa1   :  { %v362_v37 = vpop.permute.xlu1 %361  ;;  %v357_v38 = vpop.permute.xlu0 %356 }
  0xa2   :  { %1582 = vst.msk [vmem:[%s4892_s1 + $0x128] sm:$0xff] %vm1544_vm0, %v362_v37  ;;  %1584 = vst.msk [vmem:[%s4892_s1 + $0x138] sm:$0xff] %vm1544_vm0, %v362_v37  ;;  %671 = vperm.xlu1 %2063, %v89_v35   ;;  %666 = vperm.xlu0 %2062, %v88_v36   ;;  %v121_v35 = vld [vmem:[%s4891_s0 + $0x388] sm:$0xff]  ;;  %v120_v36 = vld [vmem:[%s4891_s0 + $0x380] sm:$0xff] }
  0xa3   :  { %1581 = vst.msk [vmem:[%s4892_s1 + $0x120] sm:$0xff] %vm1544_vm0, %v357_v38  ;;  %1583 = vst.msk [vmem:[%s4892_s1 + $0x130] sm:$0xff] %vm1544_vm0, %v357_v38 }
  0xa5   :  { %v372_v41 = vpop.permute.xlu1 %371  ;;  %v367_v42 = vpop.permute.xlu0 %366 }
  0xa6   :  { %1586 = vst.msk [vmem:[%s4892_s1 + $0x148] sm:$0xff] %vm1544_vm0, %v372_v41  ;;  %1588 = vst.msk [vmem:[%s4892_s1 + $0x158] sm:$0xff] %vm1544_vm0, %v372_v41  ;;  %681 = vperm.xlu1 %2063, %v91_v39   ;;  %676 = vperm.xlu0 %2062, %v90_v40   ;;  %v123_v39 = vld [vmem:[%s4891_s0 + $0x398] sm:$0xff]  ;;  %v122_v40 = vld [vmem:[%s4891_s0 + $0x390] sm:$0xff] }
  0xa7   :  { %1585 = vst.msk [vmem:[%s4892_s1 + $0x140] sm:$0xff] %vm1544_vm0, %v367_v42  ;;  %1587 = vst.msk [vmem:[%s4892_s1 + $0x150] sm:$0xff] %vm1544_vm0, %v367_v42 }
  0xa9   :  { %v382_v45 = vpop.permute.xlu1 %381  ;;  %v377_v46 = vpop.permute.xlu0 %376 }
  0xaa   :  { %1590 = vst.msk [vmem:[%s4892_s1 + $0x168] sm:$0xff] %vm1544_vm0, %v382_v45  ;;  %1592 = vst.msk [vmem:[%s4892_s1 + $0x178] sm:$0xff] %vm1544_vm0, %v382_v45  ;;  %691 = vperm.xlu1 %2063, %v93_v43   ;;  %686 = vperm.xlu0 %2062, %v92_v44   ;;  %v125_v43 = vld [vmem:[%s4891_s0 + $0x3a8] sm:$0xff]  ;;  %v124_v44 = vld [vmem:[%s4891_s0 + $0x3a0] sm:$0xff] }
  0xab   :  { %1589 = vst.msk [vmem:[%s4892_s1 + $0x160] sm:$0xff] %vm1544_vm0, %v377_v46  ;;  %1591 = vst.msk [vmem:[%s4892_s1 + $0x170] sm:$0xff] %vm1544_vm0, %v377_v46 }
  0xad   :  { %v392_v49 = vpop.permute.xlu1 %391  ;;  %v387_v50 = vpop.permute.xlu0 %386 }
  0xae   :  { %1594 = vst.msk [vmem:[%s4892_s1 + $0x188] sm:$0xff] %vm1544_vm0, %v392_v49  ;;  %1596 = vst.msk [vmem:[%s4892_s1 + $0x198] sm:$0xff] %vm1544_vm0, %v392_v49  ;;  %701 = vperm.xlu1 %2063, %v95_v47   ;;  %696 = vperm.xlu0 %2062, %v94_v48   ;;  %v127_v47 = vld [vmem:[%s4891_s0 + $0x3b8] sm:$0xff]  ;;  %v126_v48 = vld [vmem:[%s4891_s0 + $0x3b0] sm:$0xff] }
  0xaf   :  { %1593 = vst.msk [vmem:[%s4892_s1 + $0x180] sm:$0xff] %vm1544_vm0, %v387_v50  ;;  %1595 = vst.msk [vmem:[%s4892_s1 + $0x190] sm:$0xff] %vm1544_vm0, %v387_v50 }
  0xb1   :  { %v402_v53 = vpop.permute.xlu1 %401  ;;  %v397_v54 = vpop.permute.xlu0 %396 }
  0xb2   :  { %1598 = vst.msk [vmem:[%s4892_s1 + $0x1a8] sm:$0xff] %vm1544_vm0, %v402_v53  ;;  %1600 = vst.msk [vmem:[%s4892_s1 + $0x1b8] sm:$0xff] %vm1544_vm0, %v402_v53  ;;  %711 = vperm.xlu1 %2063, %v97_v51   ;;  %706 = vperm.xlu0 %2062, %v96_v52   ;;  %v129_v51 = vld [vmem:[%s4891_s0 + $0x3c8] sm:$0xff]  ;;  %v128_v52 = vld [vmem:[%s4891_s0 + $0x3c0] sm:$0xff] }
  0xb3   :  { %1597 = vst.msk [vmem:[%s4892_s1 + $0x1a0] sm:$0xff] %vm1544_vm0, %v397_v54  ;;  %1599 = vst.msk [vmem:[%s4892_s1 + $0x1b0] sm:$0xff] %vm1544_vm0, %v397_v54 }
  0xb5   :  { %v412_v57 = vpop.permute.xlu1 %411  ;;  %v407_v58 = vpop.permute.xlu0 %406 }
  0xb6   :  { %1602 = vst.msk [vmem:[%s4892_s1 + $0x1c8] sm:$0xff] %vm1544_vm0, %v412_v57  ;;  %1604 = vst.msk [vmem:[%s4892_s1 + $0x1d8] sm:$0xff] %vm1544_vm0, %v412_v57  ;;  %721 = vperm.xlu1 %2063, %v99_v55   ;;  %716 = vperm.xlu0 %2062, %v98_v56   ;;  %v131_v55 = vld [vmem:[%s4891_s0 + $0x3d8] sm:$0xff]  ;;  %v130_v56 = vld [vmem:[%s4891_s0 + $0x3d0] sm:$0xff] }
  0xb7   :  { %1601 = vst.msk [vmem:[%s4892_s1 + $0x1c0] sm:$0xff] %vm1544_vm0, %v407_v58  ;;  %1603 = vst.msk [vmem:[%s4892_s1 + $0x1d0] sm:$0xff] %vm1544_vm0, %v407_v58 }
  0xb9   :  { %v422_v61 = vpop.permute.xlu1 %421  ;;  %v417_v62 = vpop.permute.xlu0 %416 }
  0xba   :  { %1606 = vst.msk [vmem:[%s4892_s1 + $0x1e8] sm:$0xff] %vm1544_vm0, %v422_v61  ;;  %1608 = vst.msk [vmem:[%s4892_s1 + $0x1f8] sm:$0xff] %vm1544_vm0, %v422_v61  ;;  %731 = vperm.xlu1 %2063, %v101_v59   ;;  %726 = vperm.xlu0 %2062, %v100_v60   ;;  %v133_v59 = vld [vmem:[%s4891_s0 + $0x3e8] sm:$0xff]  ;;  %v132_v60 = vld [vmem:[%s4891_s0 + $0x3e0] sm:$0xff] }
  0xbb   :  { %1605 = vst.msk [vmem:[%s4892_s1 + $0x1e0] sm:$0xff] %vm1544_vm0, %v417_v62  ;;  %1607 = vst.msk [vmem:[%s4892_s1 + $0x1f0] sm:$0xff] %vm1544_vm0, %v417_v62 }
  0xbd   :  { %v432_v1 = vpop.permute.xlu1 %431  ;;  %v427_v2 = vpop.permute.xlu0 %426 }
  0xbe   :  { %1610 = vst.msk [vmem:[%s4892_s1 + $0x208] sm:$0xff] %vm1544_vm0, %v432_v1  ;;  %1612 = vst.msk [vmem:[%s4892_s1 + $0x218] sm:$0xff] %vm1544_vm0, %v432_v1  ;;  %741 = vperm.xlu1 %2063, %v103_v63   ;;  %736 = vperm.xlu0 %2062, %v102_v0   ;;  %v135_v63 = vld [vmem:[%s4891_s0 + $0x3f8] sm:$0xff]  ;;  %v134_v0 = vld [vmem:[%s4891_s0 + $0x3f0] sm:$0xff] }
  0xbf   :  { %1609 = vst.msk [vmem:[%s4892_s1 + $0x200] sm:$0xff] %vm1544_vm0, %v427_v2  ;;  %1611 = vst.msk [vmem:[%s4892_s1 + $0x210] sm:$0xff] %vm1544_vm0, %v427_v2 }
  0xc1   :  { %v442_v5 = vpop.permute.xlu1 %441  ;;  %v437_v6 = vpop.permute.xlu0 %436 }
  0xc2   :  { %1614 = vst.msk [vmem:[%s4892_s1 + $0x228] sm:$0xff] %vm1544_vm0, %v442_v5  ;;  %1616 = vst.msk [vmem:[%s4892_s1 + $0x238] sm:$0xff] %vm1544_vm0, %v442_v5  ;;  %751 = vperm.xlu1 %2063, %v105_v3   ;;  %746 = vperm.xlu0 %2062, %v104_v4   ;;  %v137_v3 = vld [vmem:[%s4891_s0 + $0x408] sm:$0xff]  ;;  %v136_v4 = vld [vmem:[%s4891_s0 + $0x400] sm:$0xff] }
  0xc3   :  { %1613 = vst.msk [vmem:[%s4892_s1 + $0x220] sm:$0xff] %vm1544_vm0, %v437_v6  ;;  %1615 = vst.msk [vmem:[%s4892_s1 + $0x230] sm:$0xff] %vm1544_vm0, %v437_v6 }
  0xc5   :  { %v452_v9 = vpop.permute.xlu1 %451  ;;  %v447_v10 = vpop.permute.xlu0 %446 }
  0xc6   :  { %1618 = vst.msk [vmem:[%s4892_s1 + $0x248] sm:$0xff] %vm1544_vm0, %v452_v9  ;;  %1620 = vst.msk [vmem:[%s4892_s1 + $0x258] sm:$0xff] %vm1544_vm0, %v452_v9  ;;  %761 = vperm.xlu1 %2063, %v107_v7   ;;  %756 = vperm.xlu0 %2062, %v106_v8   ;;  %v139_v7 = vld [vmem:[%s4891_s0 + $0x418] sm:$0xff]  ;;  %v138_v8 = vld [vmem:[%s4891_s0 + $0x410] sm:$0xff] }
  0xc7   :  { %1617 = vst.msk [vmem:[%s4892_s1 + $0x240] sm:$0xff] %vm1544_vm0, %v447_v10  ;;  %1619 = vst.msk [vmem:[%s4892_s1 + $0x250] sm:$0xff] %vm1544_vm0, %v447_v10 }
  0xc9   :  { %v462_v13 = vpop.permute.xlu1 %461  ;;  %v457_v14 = vpop.permute.xlu0 %456 }
  0xca   :  { %1622 = vst.msk [vmem:[%s4892_s1 + $0x268] sm:$0xff] %vm1544_vm0, %v462_v13  ;;  %1624 = vst.msk [vmem:[%s4892_s1 + $0x278] sm:$0xff] %vm1544_vm0, %v462_v13  ;;  %771 = vperm.xlu1 %2063, %v109_v11   ;;  %766 = vperm.xlu0 %2062, %v108_v12   ;;  %v141_v11 = vld [vmem:[%s4891_s0 + $0x428] sm:$0xff]  ;;  %v140_v12 = vld [vmem:[%s4891_s0 + $0x420] sm:$0xff] }
  0xcb   :  { %1621 = vst.msk [vmem:[%s4892_s1 + $0x260] sm:$0xff] %vm1544_vm0, %v457_v14  ;;  %1623 = vst.msk [vmem:[%s4892_s1 + $0x270] sm:$0xff] %vm1544_vm0, %v457_v14 }
  0xcd   :  { %v472_v17 = vpop.permute.xlu1 %471  ;;  %v467_v18 = vpop.permute.xlu0 %466 }
  0xce   :  { %1626 = vst.msk [vmem:[%s4892_s1 + $0x288] sm:$0xff] %vm1544_vm0, %v472_v17  ;;  %1628 = vst.msk [vmem:[%s4892_s1 + $0x298] sm:$0xff] %vm1544_vm0, %v472_v17  ;;  %781 = vperm.xlu1 %2063, %v111_v15   ;;  %776 = vperm.xlu0 %2062, %v110_v16   ;;  %v143_v15 = vld [vmem:[%s4891_s0 + $0x438] sm:$0xff]  ;;  %v142_v16 = vld [vmem:[%s4891_s0 + $0x430] sm:$0xff] }
  0xcf   :  { %1625 = vst.msk [vmem:[%s4892_s1 + $0x280] sm:$0xff] %vm1544_vm0, %v467_v18  ;;  %1627 = vst.msk [vmem:[%s4892_s1 + $0x290] sm:$0xff] %vm1544_vm0, %v467_v18 }
  0xd1   :  { %v482_v21 = vpop.permute.xlu1 %481  ;;  %v477_v22 = vpop.permute.xlu0 %476 }
  0xd2   :  { %1630 = vst.msk [vmem:[%s4892_s1 + $0x2a8] sm:$0xff] %vm1544_vm0, %v482_v21  ;;  %1632 = vst.msk [vmem:[%s4892_s1 + $0x2b8] sm:$0xff] %vm1544_vm0, %v482_v21  ;;  %791 = vperm.xlu1 %2063, %v113_v19   ;;  %786 = vperm.xlu0 %2062, %v112_v20   ;;  %v145_v19 = vld [vmem:[%s4891_s0 + $0x448] sm:$0xff]  ;;  %v144_v20 = vld [vmem:[%s4891_s0 + $0x440] sm:$0xff] }
  0xd3   :  { %1629 = vst.msk [vmem:[%s4892_s1 + $0x2a0] sm:$0xff] %vm1544_vm0, %v477_v22  ;;  %1631 = vst.msk [vmem:[%s4892_s1 + $0x2b0] sm:$0xff] %vm1544_vm0, %v477_v22 }
  0xd5   :  { %v492_v25 = vpop.permute.xlu1 %491  ;;  %v487_v26 = vpop.permute.xlu0 %486 }
  0xd6   :  { %1634 = vst.msk [vmem:[%s4892_s1 + $0x2c8] sm:$0xff] %vm1544_vm0, %v492_v25  ;;  %1636 = vst.msk [vmem:[%s4892_s1 + $0x2d8] sm:$0xff] %vm1544_vm0, %v492_v25  ;;  %801 = vperm.xlu1 %2063, %v115_v23   ;;  %796 = vperm.xlu0 %2062, %v114_v24   ;;  %v147_v23 = vld [vmem:[%s4891_s0 + $0x458] sm:$0xff]  ;;  %v146_v24 = vld [vmem:[%s4891_s0 + $0x450] sm:$0xff] }
  0xd7   :  { %1633 = vst.msk [vmem:[%s4892_s1 + $0x2c0] sm:$0xff] %vm1544_vm0, %v487_v26  ;;  %1635 = vst.msk [vmem:[%s4892_s1 + $0x2d0] sm:$0xff] %vm1544_vm0, %v487_v26 }
  0xd9   :  { %v502_v29 = vpop.permute.xlu1 %501  ;;  %v497_v30 = vpop.permute.xlu0 %496 }
  0xda   :  { %1638 = vst.msk [vmem:[%s4892_s1 + $0x2e8] sm:$0xff] %vm1544_vm0, %v502_v29  ;;  %1640 = vst.msk [vmem:[%s4892_s1 + $0x2f8] sm:$0xff] %vm1544_vm0, %v502_v29  ;;  %811 = vperm.xlu1 %2063, %v117_v27   ;;  %806 = vperm.xlu0 %2062, %v116_v28   ;;  %v149_v27 = vld [vmem:[%s4891_s0 + $0x468] sm:$0xff]  ;;  %v148_v28 = vld [vmem:[%s4891_s0 + $0x460] sm:$0xff] }
  0xdb   :  { %1637 = vst.msk [vmem:[%s4892_s1 + $0x2e0] sm:$0xff] %vm1544_vm0, %v497_v30  ;;  %1639 = vst.msk [vmem:[%s4892_s1 + $0x2f0] sm:$0xff] %vm1544_vm0, %v497_v30 }
  0xdd   :  { %v512_v33 = vpop.permute.xlu1 %511  ;;  %v507_v34 = vpop.permute.xlu0 %506 }
  0xde   :  { %1642 = vst.msk [vmem:[%s4892_s1 + $0x308] sm:$0xff] %vm1544_vm0, %v512_v33  ;;  %1644 = vst.msk [vmem:[%s4892_s1 + $0x318] sm:$0xff] %vm1544_vm0, %v512_v33  ;;  %821 = vperm.xlu1 %2063, %v119_v31   ;;  %816 = vperm.xlu0 %2062, %v118_v32   ;;  %v151_v31 = vld [vmem:[%s4891_s0 + $0x478] sm:$0xff]  ;;  %v150_v32 = vld [vmem:[%s4891_s0 + $0x470] sm:$0xff] }
  0xdf   :  { %1641 = vst.msk [vmem:[%s4892_s1 + $0x300] sm:$0xff] %vm1544_vm0, %v507_v34  ;;  %1643 = vst.msk [vmem:[%s4892_s1 + $0x310] sm:$0xff] %vm1544_vm0, %v507_v34 }
  0xe1   :  { %v522_v37 = vpop.permute.xlu1 %521  ;;  %v517_v38 = vpop.permute.xlu0 %516 }
  0xe2   :  { %1646 = vst.msk [vmem:[%s4892_s1 + $0x328] sm:$0xff] %vm1544_vm0, %v522_v37  ;;  %1648 = vst.msk [vmem:[%s4892_s1 + $0x338] sm:$0xff] %vm1544_vm0, %v522_v37  ;;  %831 = vperm.xlu1 %2063, %v121_v35   ;;  %826 = vperm.xlu0 %2062, %v120_v36   ;;  %v153_v35 = vld [vmem:[%s4891_s0 + $0x488] sm:$0xff]  ;;  %v152_v36 = vld [vmem:[%s4891_s0 + $0x480] sm:$0xff] }
  0xe3   :  { %1645 = vst.msk [vmem:[%s4892_s1 + $0x320] sm:$0xff] %vm1544_vm0, %v517_v38  ;;  %1647 = vst.msk [vmem:[%s4892_s1 + $0x330] sm:$0xff] %vm1544_vm0, %v517_v38 }
  0xe5   :  { %v532_v41 = vpop.permute.xlu1 %531  ;;  %v527_v42 = vpop.permute.xlu0 %526 }
  0xe6   :  { %1650 = vst.msk [vmem:[%s4892_s1 + $0x348] sm:$0xff] %vm1544_vm0, %v532_v41  ;;  %1652 = vst.msk [vmem:[%s4892_s1 + $0x358] sm:$0xff] %vm1544_vm0, %v532_v41  ;;  %841 = vperm.xlu1 %2063, %v123_v39   ;;  %836 = vperm.xlu0 %2062, %v122_v40   ;;  %v155_v39 = vld [vmem:[%s4891_s0 + $0x498] sm:$0xff]  ;;  %v154_v40 = vld [vmem:[%s4891_s0 + $0x490] sm:$0xff] }
  0xe7   :  { %1649 = vst.msk [vmem:[%s4892_s1 + $0x340] sm:$0xff] %vm1544_vm0, %v527_v42  ;;  %1651 = vst.msk [vmem:[%s4892_s1 + $0x350] sm:$0xff] %vm1544_vm0, %v527_v42 }
  0xe9   :  { %v542_v45 = vpop.permute.xlu1 %541  ;;  %v537_v46 = vpop.permute.xlu0 %536 }
  0xea   :  { %1654 = vst.msk [vmem:[%s4892_s1 + $0x368] sm:$0xff] %vm1544_vm0, %v542_v45  ;;  %1656 = vst.msk [vmem:[%s4892_s1 + $0x378] sm:$0xff] %vm1544_vm0, %v542_v45  ;;  %851 = vperm.xlu1 %2063, %v125_v43   ;;  %846 = vperm.xlu0 %2062, %v124_v44   ;;  %v157_v43 = vld [vmem:[%s4891_s0 + $0x4a8] sm:$0xff]  ;;  %v156_v44 = vld [vmem:[%s4891_s0 + $0x4a0] sm:$0xff] }
  0xeb   :  { %1653 = vst.msk [vmem:[%s4892_s1 + $0x360] sm:$0xff] %vm1544_vm0, %v537_v46  ;;  %1655 = vst.msk [vmem:[%s4892_s1 + $0x370] sm:$0xff] %vm1544_vm0, %v537_v46 }
  0xed   :  { %v552_v49 = vpop.permute.xlu1 %551  ;;  %v547_v50 = vpop.permute.xlu0 %546 }
  0xee   :  { %1658 = vst.msk [vmem:[%s4892_s1 + $0x388] sm:$0xff] %vm1544_vm0, %v552_v49  ;;  %1660 = vst.msk [vmem:[%s4892_s1 + $0x398] sm:$0xff] %vm1544_vm0, %v552_v49  ;;  %861 = vperm.xlu1 %2063, %v127_v47   ;;  %856 = vperm.xlu0 %2062, %v126_v48   ;;  %v159_v47 = vld [vmem:[%s4891_s0 + $0x4b8] sm:$0xff]  ;;  %v158_v48 = vld [vmem:[%s4891_s0 + $0x4b0] sm:$0xff] }
  0xef   :  { %1657 = vst.msk [vmem:[%s4892_s1 + $0x380] sm:$0xff] %vm1544_vm0, %v547_v50  ;;  %1659 = vst.msk [vmem:[%s4892_s1 + $0x390] sm:$0xff] %vm1544_vm0, %v547_v50 }
  0xf1   :  { %v562_v53 = vpop.permute.xlu1 %561  ;;  %v557_v54 = vpop.permute.xlu0 %556 }
  0xf2   :  { %1662 = vst.msk [vmem:[%s4892_s1 + $0x3a8] sm:$0xff] %vm1544_vm0, %v562_v53  ;;  %1664 = vst.msk [vmem:[%s4892_s1 + $0x3b8] sm:$0xff] %vm1544_vm0, %v562_v53  ;;  %871 = vperm.xlu1 %2063, %v129_v51   ;;  %866 = vperm.xlu0 %2062, %v128_v52   ;;  %v161_v51 = vld [vmem:[%s4891_s0 + $0x4c8] sm:$0xff]  ;;  %v160_v52 = vld [vmem:[%s4891_s0 + $0x4c0] sm:$0xff] }
  0xf3   :  { %1661 = vst.msk [vmem:[%s4892_s1 + $0x3a0] sm:$0xff] %vm1544_vm0, %v557_v54  ;;  %1663 = vst.msk [vmem:[%s4892_s1 + $0x3b0] sm:$0xff] %vm1544_vm0, %v557_v54 }
  0xf5   :  { %v572_v57 = vpop.permute.xlu1 %571  ;;  %v567_v58 = vpop.permute.xlu0 %566 }
  0xf6   :  { %1666 = vst.msk [vmem:[%s4892_s1 + $0x3c8] sm:$0xff] %vm1544_vm0, %v572_v57  ;;  %1668 = vst.msk [vmem:[%s4892_s1 + $0x3d8] sm:$0xff] %vm1544_vm0, %v572_v57  ;;  %881 = vperm.xlu1 %2063, %v131_v55   ;;  %876 = vperm.xlu0 %2062, %v130_v56   ;;  %v163_v55 = vld [vmem:[%s4891_s0 + $0x4d8] sm:$0xff]  ;;  %v162_v56 = vld [vmem:[%s4891_s0 + $0x4d0] sm:$0xff] }
  0xf7   :  { %1665 = vst.msk [vmem:[%s4892_s1 + $0x3c0] sm:$0xff] %vm1544_vm0, %v567_v58  ;;  %1667 = vst.msk [vmem:[%s4892_s1 + $0x3d0] sm:$0xff] %vm1544_vm0, %v567_v58 }
  0xf9   :  { %v582_v61 = vpop.permute.xlu1 %581  ;;  %v577_v62 = vpop.permute.xlu0 %576 }
  0xfa   :  { %1670 = vst.msk [vmem:[%s4892_s1 + $0x3e8] sm:$0xff] %vm1544_vm0, %v582_v61  ;;  %1672 = vst.msk [vmem:[%s4892_s1 + $0x3f8] sm:$0xff] %vm1544_vm0, %v582_v61  ;;  %891 = vperm.xlu1 %2063, %v133_v59   ;;  %886 = vperm.xlu0 %2062, %v132_v60   ;;  %v165_v59 = vld [vmem:[%s4891_s0 + $0x4e8] sm:$0xff]  ;;  %v164_v60 = vld [vmem:[%s4891_s0 + $0x4e0] sm:$0xff] }
  0xfb   :  { %1669 = vst.msk [vmem:[%s4892_s1 + $0x3e0] sm:$0xff] %vm1544_vm0, %v577_v62  ;;  %1671 = vst.msk [vmem:[%s4892_s1 + $0x3f0] sm:$0xff] %vm1544_vm0, %v577_v62 }
  0xfd   :  { %v592_v1 = vpop.permute.xlu1 %591  ;;  %v587_v2 = vpop.permute.xlu0 %586 }
  0xfe   :  { %1674 = vst.msk [vmem:[%s4892_s1 + $0x408] sm:$0xff] %vm1544_vm0, %v592_v1  ;;  %1676 = vst.msk [vmem:[%s4892_s1 + $0x418] sm:$0xff] %vm1544_vm0, %v592_v1  ;;  %901 = vperm.xlu1 %2063, %v135_v63   ;;  %896 = vperm.xlu0 %2062, %v134_v0   ;;  %v167_v63 = vld [vmem:[%s4891_s0 + $0x4f8] sm:$0xff]  ;;  %v166_v0 = vld [vmem:[%s4891_s0 + $0x4f0] sm:$0xff] }
  0xff   :  { %1673 = vst.msk [vmem:[%s4892_s1 + $0x400] sm:$0xff] %vm1544_vm0, %v587_v2  ;;  %1675 = vst.msk [vmem:[%s4892_s1 + $0x410] sm:$0xff] %vm1544_vm0, %v587_v2 }
 0x101   :  { %v602_v5 = vpop.permute.xlu1 %601  ;;  %v597_v6 = vpop.permute.xlu0 %596 }
 0x102   :  { %1678 = vst.msk [vmem:[%s4892_s1 + $0x428] sm:$0xff] %vm1544_vm0, %v602_v5  ;;  %1680 = vst.msk [vmem:[%s4892_s1 + $0x438] sm:$0xff] %vm1544_vm0, %v602_v5  ;;  %911 = vperm.xlu1 %2063, %v137_v3   ;;  %906 = vperm.xlu0 %2062, %v136_v4   ;;  %v169_v3 = vld [vmem:[%s4891_s0 + $0x508] sm:$0xff]  ;;  %v168_v4 = vld [vmem:[%s4891_s0 + $0x500] sm:$0xff] }
 0x103   :  { %1677 = vst.msk [vmem:[%s4892_s1 + $0x420] sm:$0xff] %vm1544_vm0, %v597_v6  ;;  %1679 = vst.msk [vmem:[%s4892_s1 + $0x430] sm:$0xff] %vm1544_vm0, %v597_v6 }
 0x105   :  { %v612_v9 = vpop.permute.xlu1 %611  ;;  %v607_v10 = vpop.permute.xlu0 %606 }
 0x106   :  { %1682 = vst.msk [vmem:[%s4892_s1 + $0x448] sm:$0xff] %vm1544_vm0, %v612_v9  ;;  %1684 = vst.msk [vmem:[%s4892_s1 + $0x458] sm:$0xff] %vm1544_vm0, %v612_v9  ;;  %921 = vperm.xlu1 %2063, %v139_v7   ;;  %916 = vperm.xlu0 %2062, %v138_v8   ;;  %v171_v7 = vld [vmem:[%s4891_s0 + $0x518] sm:$0xff]  ;;  %v170_v8 = vld [vmem:[%s4891_s0 + $0x510] sm:$0xff] }
 0x107   :  { %1681 = vst.msk [vmem:[%s4892_s1 + $0x440] sm:$0xff] %vm1544_vm0, %v607_v10  ;;  %1683 = vst.msk [vmem:[%s4892_s1 + $0x450] sm:$0xff] %vm1544_vm0, %v607_v10 }
 0x109   :  { %v622_v13 = vpop.permute.xlu1 %621  ;;  %v617_v14 = vpop.permute.xlu0 %616 }
 0x10a   :  { %1686 = vst.msk [vmem:[%s4892_s1 + $0x468] sm:$0xff] %vm1544_vm0, %v622_v13  ;;  %1688 = vst.msk [vmem:[%s4892_s1 + $0x478] sm:$0xff] %vm1544_vm0, %v622_v13  ;;  %931 = vperm.xlu1 %2063, %v141_v11   ;;  %926 = vperm.xlu0 %2062, %v140_v12   ;;  %v173_v11 = vld [vmem:[%s4891_s0 + $0x528] sm:$0xff]  ;;  %v172_v12 = vld [vmem:[%s4891_s0 + $0x520] sm:$0xff] }
 0x10b   :  { %1685 = vst.msk [vmem:[%s4892_s1 + $0x460] sm:$0xff] %vm1544_vm0, %v617_v14  ;;  %1687 = vst.msk [vmem:[%s4892_s1 + $0x470] sm:$0xff] %vm1544_vm0, %v617_v14 }
 0x10d   :  { %v632_v17 = vpop.permute.xlu1 %631  ;;  %v627_v18 = vpop.permute.xlu0 %626 }
 0x10e   :  { %1690 = vst.msk [vmem:[%s4892_s1 + $0x488] sm:$0xff] %vm1544_vm0, %v632_v17  ;;  %1692 = vst.msk [vmem:[%s4892_s1 + $0x498] sm:$0xff] %vm1544_vm0, %v632_v17  ;;  %941 = vperm.xlu1 %2063, %v143_v15   ;;  %936 = vperm.xlu0 %2062, %v142_v16   ;;  %v175_v15 = vld [vmem:[%s4891_s0 + $0x538] sm:$0xff]  ;;  %v174_v16 = vld [vmem:[%s4891_s0 + $0x530] sm:$0xff] }
 0x10f   :  { %1689 = vst.msk [vmem:[%s4892_s1 + $0x480] sm:$0xff] %vm1544_vm0, %v627_v18  ;;  %1691 = vst.msk [vmem:[%s4892_s1 + $0x490] sm:$0xff] %vm1544_vm0, %v627_v18 }
 0x111   :  { %v642_v21 = vpop.permute.xlu1 %641  ;;  %v637_v22 = vpop.permute.xlu0 %636 }
 0x112   :  { %1694 = vst.msk [vmem:[%s4892_s1 + $0x4a8] sm:$0xff] %vm1544_vm0, %v642_v21  ;;  %1696 = vst.msk [vmem:[%s4892_s1 + $0x4b8] sm:$0xff] %vm1544_vm0, %v642_v21  ;;  %951 = vperm.xlu1 %2063, %v145_v19   ;;  %946 = vperm.xlu0 %2062, %v144_v20   ;;  %v177_v19 = vld [vmem:[%s4891_s0 + $0x548] sm:$0xff]  ;;  %v176_v20 = vld [vmem:[%s4891_s0 + $0x540] sm:$0xff] }
 0x113   :  { %1693 = vst.msk [vmem:[%s4892_s1 + $0x4a0] sm:$0xff] %vm1544_vm0, %v637_v22  ;;  %1695 = vst.msk [vmem:[%s4892_s1 + $0x4b0] sm:$0xff] %vm1544_vm0, %v637_v22 }
 0x115   :  { %v652_v25 = vpop.permute.xlu1 %651  ;;  %v647_v26 = vpop.permute.xlu0 %646 }
 0x116   :  { %1698 = vst.msk [vmem:[%s4892_s1 + $0x4c8] sm:$0xff] %vm1544_vm0, %v652_v25  ;;  %1700 = vst.msk [vmem:[%s4892_s1 + $0x4d8] sm:$0xff] %vm1544_vm0, %v652_v25  ;;  %961 = vperm.xlu1 %2063, %v147_v23   ;;  %956 = vperm.xlu0 %2062, %v146_v24   ;;  %v179_v23 = vld [vmem:[%s4891_s0 + $0x558] sm:$0xff]  ;;  %v178_v24 = vld [vmem:[%s4891_s0 + $0x550] sm:$0xff] }
 0x117   :  { %1697 = vst.msk [vmem:[%s4892_s1 + $0x4c0] sm:$0xff] %vm1544_vm0, %v647_v26  ;;  %1699 = vst.msk [vmem:[%s4892_s1 + $0x4d0] sm:$0xff] %vm1544_vm0, %v647_v26 }
 0x119   :  { %v662_v29 = vpop.permute.xlu1 %661  ;;  %v657_v30 = vpop.permute.xlu0 %656 }
 0x11a   :  { %1702 = vst.msk [vmem:[%s4892_s1 + $0x4e8] sm:$0xff] %vm1544_vm0, %v662_v29  ;;  %1704 = vst.msk [vmem:[%s4892_s1 + $0x4f8] sm:$0xff] %vm1544_vm0, %v662_v29  ;;  %971 = vperm.xlu1 %2063, %v149_v27   ;;  %966 = vperm.xlu0 %2062, %v148_v28   ;;  %v181_v27 = vld [vmem:[%s4891_s0 + $0x568] sm:$0xff]  ;;  %v180_v28 = vld [vmem:[%s4891_s0 + $0x560] sm:$0xff] }
 0x11b   :  { %1701 = vst.msk [vmem:[%s4892_s1 + $0x4e0] sm:$0xff] %vm1544_vm0, %v657_v30  ;;  %1703 = vst.msk [vmem:[%s4892_s1 + $0x4f0] sm:$0xff] %vm1544_vm0, %v657_v30 }
 0x11d   :  { %v672_v33 = vpop.permute.xlu1 %671  ;;  %v667_v34 = vpop.permute.xlu0 %666 }
 0x11e   :  { %1706 = vst.msk [vmem:[%s4892_s1 + $0x508] sm:$0xff] %vm1544_vm0, %v672_v33  ;;  %1708 = vst.msk [vmem:[%s4892_s1 + $0x518] sm:$0xff] %vm1544_vm0, %v672_v33  ;;  %981 = vperm.xlu1 %2063, %v151_v31   ;;  %976 = vperm.xlu0 %2062, %v150_v32   ;;  %v183_v31 = vld [vmem:[%s4891_s0 + $0x578] sm:$0xff]  ;;  %v182_v32 = vld [vmem:[%s4891_s0 + $0x570] sm:$0xff] }
 0x11f   :  { %1705 = vst.msk [vmem:[%s4892_s1 + $0x500] sm:$0xff] %vm1544_vm0, %v667_v34  ;;  %1707 = vst.msk [vmem:[%s4892_s1 + $0x510] sm:$0xff] %vm1544_vm0, %v667_v34 }
 0x121   :  { %v682_v37 = vpop.permute.xlu1 %681  ;;  %v677_v38 = vpop.permute.xlu0 %676 }
 0x122   :  { %1710 = vst.msk [vmem:[%s4892_s1 + $0x528] sm:$0xff] %vm1544_vm0, %v682_v37  ;;  %1712 = vst.msk [vmem:[%s4892_s1 + $0x538] sm:$0xff] %vm1544_vm0, %v682_v37  ;;  %991 = vperm.xlu1 %2063, %v153_v35   ;;  %986 = vperm.xlu0 %2062, %v152_v36   ;;  %v185_v35 = vld [vmem:[%s4891_s0 + $0x588] sm:$0xff]  ;;  %v184_v36 = vld [vmem:[%s4891_s0 + $0x580] sm:$0xff] }
 0x123   :  { %1709 = vst.msk [vmem:[%s4892_s1 + $0x520] sm:$0xff] %vm1544_vm0, %v677_v38  ;;  %1711 = vst.msk [vmem:[%s4892_s1 + $0x530] sm:$0xff] %vm1544_vm0, %v677_v38 }
 0x125   :  { %v692_v41 = vpop.permute.xlu1 %691  ;;  %v687_v42 = vpop.permute.xlu0 %686 }
 0x126   :  { %1714 = vst.msk [vmem:[%s4892_s1 + $0x548] sm:$0xff] %vm1544_vm0, %v692_v41  ;;  %1716 = vst.msk [vmem:[%s4892_s1 + $0x558] sm:$0xff] %vm1544_vm0, %v692_v41  ;;  %1001 = vperm.xlu1 %2063, %v155_v39   ;;  %996 = vperm.xlu0 %2062, %v154_v40   ;;  %v187_v39 = vld [vmem:[%s4891_s0 + $0x598] sm:$0xff]  ;;  %v186_v40 = vld [vmem:[%s4891_s0 + $0x590] sm:$0xff] }
 0x127   :  { %1713 = vst.msk [vmem:[%s4892_s1 + $0x540] sm:$0xff] %vm1544_vm0, %v687_v42  ;;  %1715 = vst.msk [vmem:[%s4892_s1 + $0x550] sm:$0xff] %vm1544_vm0, %v687_v42 }
 0x129   :  { %v702_v45 = vpop.permute.xlu1 %701  ;;  %v697_v46 = vpop.permute.xlu0 %696 }
 0x12a   :  { %1718 = vst.msk [vmem:[%s4892_s1 + $0x568] sm:$0xff] %vm1544_vm0, %v702_v45  ;;  %1720 = vst.msk [vmem:[%s4892_s1 + $0x578] sm:$0xff] %vm1544_vm0, %v702_v45  ;;  %1011 = vperm.xlu1 %2063, %v157_v43   ;;  %1006 = vperm.xlu0 %2062, %v156_v44   ;;  %v189_v43 = vld [vmem:[%s4891_s0 + $0x5a8] sm:$0xff]  ;;  %v188_v44 = vld [vmem:[%s4891_s0 + $0x5a0] sm:$0xff] }
 0x12b   :  { %1717 = vst.msk [vmem:[%s4892_s1 + $0x560] sm:$0xff] %vm1544_vm0, %v697_v46  ;;  %1719 = vst.msk [vmem:[%s4892_s1 + $0x570] sm:$0xff] %vm1544_vm0, %v697_v46 }
 0x12d   :  { %v712_v49 = vpop.permute.xlu1 %711  ;;  %v707_v50 = vpop.permute.xlu0 %706 }
 0x12e   :  { %1722 = vst.msk [vmem:[%s4892_s1 + $0x588] sm:$0xff] %vm1544_vm0, %v712_v49  ;;  %1724 = vst.msk [vmem:[%s4892_s1 + $0x598] sm:$0xff] %vm1544_vm0, %v712_v49  ;;  %1021 = vperm.xlu1 %2063, %v159_v47   ;;  %1016 = vperm.xlu0 %2062, %v158_v48   ;;  %v191_v47 = vld [vmem:[%s4891_s0 + $0x5b8] sm:$0xff]  ;;  %v190_v48 = vld [vmem:[%s4891_s0 + $0x5b0] sm:$0xff] }
 0x12f   :  { %1721 = vst.msk [vmem:[%s4892_s1 + $0x580] sm:$0xff] %vm1544_vm0, %v707_v50  ;;  %1723 = vst.msk [vmem:[%s4892_s1 + $0x590] sm:$0xff] %vm1544_vm0, %v707_v50 }
 0x131   :  { %v722_v53 = vpop.permute.xlu1 %721  ;;  %v717_v54 = vpop.permute.xlu0 %716 }
 0x132   :  { %1726 = vst.msk [vmem:[%s4892_s1 + $0x5a8] sm:$0xff] %vm1544_vm0, %v722_v53  ;;  %1728 = vst.msk [vmem:[%s4892_s1 + $0x5b8] sm:$0xff] %vm1544_vm0, %v722_v53  ;;  %1031 = vperm.xlu1 %2063, %v161_v51   ;;  %1026 = vperm.xlu0 %2062, %v160_v52   ;;  %v193_v51 = vld [vmem:[%s4891_s0 + $0x5c8] sm:$0xff]  ;;  %v192_v52 = vld [vmem:[%s4891_s0 + $0x5c0] sm:$0xff] }
 0x133   :  { %1725 = vst.msk [vmem:[%s4892_s1 + $0x5a0] sm:$0xff] %vm1544_vm0, %v717_v54  ;;  %1727 = vst.msk [vmem:[%s4892_s1 + $0x5b0] sm:$0xff] %vm1544_vm0, %v717_v54 }
 0x135   :  { %v732_v57 = vpop.permute.xlu1 %731  ;;  %v727_v58 = vpop.permute.xlu0 %726 }
 0x136   :  { %1730 = vst.msk [vmem:[%s4892_s1 + $0x5c8] sm:$0xff] %vm1544_vm0, %v732_v57  ;;  %1732 = vst.msk [vmem:[%s4892_s1 + $0x5d8] sm:$0xff] %vm1544_vm0, %v732_v57  ;;  %1041 = vperm.xlu1 %2063, %v163_v55   ;;  %1036 = vperm.xlu0 %2062, %v162_v56   ;;  %v195_v55 = vld [vmem:[%s4891_s0 + $0x5d8] sm:$0xff]  ;;  %v194_v56 = vld [vmem:[%s4891_s0 + $0x5d0] sm:$0xff] }
 0x137   :  { %1729 = vst.msk [vmem:[%s4892_s1 + $0x5c0] sm:$0xff] %vm1544_vm0, %v727_v58  ;;  %1731 = vst.msk [vmem:[%s4892_s1 + $0x5d0] sm:$0xff] %vm1544_vm0, %v727_v58 }
 0x139   :  { %v742_v61 = vpop.permute.xlu1 %741  ;;  %v737_v62 = vpop.permute.xlu0 %736 }
 0x13a   :  { %1734 = vst.msk [vmem:[%s4892_s1 + $0x5e8] sm:$0xff] %vm1544_vm0, %v742_v61  ;;  %1736 = vst.msk [vmem:[%s4892_s1 + $0x5f8] sm:$0xff] %vm1544_vm0, %v742_v61  ;;  %1051 = vperm.xlu1 %2063, %v165_v59   ;;  %1046 = vperm.xlu0 %2062, %v164_v60   ;;  %v197_v59 = vld [vmem:[%s4891_s0 + $0x5e8] sm:$0xff]  ;;  %v196_v60 = vld [vmem:[%s4891_s0 + $0x5e0] sm:$0xff] }
 0x13b   :  { %1733 = vst.msk [vmem:[%s4892_s1 + $0x5e0] sm:$0xff] %vm1544_vm0, %v737_v62  ;;  %1735 = vst.msk [vmem:[%s4892_s1 + $0x5f0] sm:$0xff] %vm1544_vm0, %v737_v62 }
 0x13d   :  { %v752_v1 = vpop.permute.xlu1 %751  ;;  %v747_v2 = vpop.permute.xlu0 %746 }
 0x13e   :  { %1738 = vst.msk [vmem:[%s4892_s1 + $0x608] sm:$0xff] %vm1544_vm0, %v752_v1  ;;  %1740 = vst.msk [vmem:[%s4892_s1 + $0x618] sm:$0xff] %vm1544_vm0, %v752_v1  ;;  %1061 = vperm.xlu1 %2063, %v167_v63   ;;  %1056 = vperm.xlu0 %2062, %v166_v0   ;;  %v199_v63 = vld [vmem:[%s4891_s0 + $0x5f8] sm:$0xff]  ;;  %v198_v0 = vld [vmem:[%s4891_s0 + $0x5f0] sm:$0xff] }
 0x13f   :  { %1737 = vst.msk [vmem:[%s4892_s1 + $0x600] sm:$0xff] %vm1544_vm0, %v747_v2  ;;  %1739 = vst.msk [vmem:[%s4892_s1 + $0x610] sm:$0xff] %vm1544_vm0, %v747_v2 }
 0x141   :  { %v762_v5 = vpop.permute.xlu1 %761  ;;  %v757_v6 = vpop.permute.xlu0 %756 }
 0x142   :  { %1742 = vst.msk [vmem:[%s4892_s1 + $0x628] sm:$0xff] %vm1544_vm0, %v762_v5  ;;  %1744 = vst.msk [vmem:[%s4892_s1 + $0x638] sm:$0xff] %vm1544_vm0, %v762_v5  ;;  %1071 = vperm.xlu1 %2063, %v169_v3   ;;  %1066 = vperm.xlu0 %2062, %v168_v4   ;;  %v201_v3 = vld [vmem:[%s4891_s0 + $0x608] sm:$0xff]  ;;  %v200_v4 = vld [vmem:[%s4891_s0 + $0x600] sm:$0xff] }
 0x143   :  { %1741 = vst.msk [vmem:[%s4892_s1 + $0x620] sm:$0xff] %vm1544_vm0, %v757_v6  ;;  %1743 = vst.msk [vmem:[%s4892_s1 + $0x630] sm:$0xff] %vm1544_vm0, %v757_v6 }
 0x145   :  { %v772_v9 = vpop.permute.xlu1 %771  ;;  %v767_v10 = vpop.permute.xlu0 %766 }
 0x146   :  { %1746 = vst.msk [vmem:[%s4892_s1 + $0x648] sm:$0xff] %vm1544_vm0, %v772_v9  ;;  %1748 = vst.msk [vmem:[%s4892_s1 + $0x658] sm:$0xff] %vm1544_vm0, %v772_v9  ;;  %1081 = vperm.xlu1 %2063, %v171_v7   ;;  %1076 = vperm.xlu0 %2062, %v170_v8   ;;  %v203_v7 = vld [vmem:[%s4891_s0 + $0x618] sm:$0xff]  ;;  %v202_v8 = vld [vmem:[%s4891_s0 + $0x610] sm:$0xff] }
 0x147   :  { %1745 = vst.msk [vmem:[%s4892_s1 + $0x640] sm:$0xff] %vm1544_vm0, %v767_v10  ;;  %1747 = vst.msk [vmem:[%s4892_s1 + $0x650] sm:$0xff] %vm1544_vm0, %v767_v10 }
 0x149   :  { %v782_v13 = vpop.permute.xlu1 %781  ;;  %v777_v14 = vpop.permute.xlu0 %776 }
 0x14a   :  { %1750 = vst.msk [vmem:[%s4892_s1 + $0x668] sm:$0xff] %vm1544_vm0, %v782_v13  ;;  %1752 = vst.msk [vmem:[%s4892_s1 + $0x678] sm:$0xff] %vm1544_vm0, %v782_v13  ;;  %1091 = vperm.xlu1 %2063, %v173_v11   ;;  %1086 = vperm.xlu0 %2062, %v172_v12   ;;  %v205_v11 = vld [vmem:[%s4891_s0 + $0x628] sm:$0xff]  ;;  %v204_v12 = vld [vmem:[%s4891_s0 + $0x620] sm:$0xff] }
 0x14b   :  { %1749 = vst.msk [vmem:[%s4892_s1 + $0x660] sm:$0xff] %vm1544_vm0, %v777_v14  ;;  %1751 = vst.msk [vmem:[%s4892_s1 + $0x670] sm:$0xff] %vm1544_vm0, %v777_v14 }
 0x14d   :  { %v792_v17 = vpop.permute.xlu1 %791  ;;  %v787_v18 = vpop.permute.xlu0 %786 }
 0x14e   :  { %1754 = vst.msk [vmem:[%s4892_s1 + $0x688] sm:$0xff] %vm1544_vm0, %v792_v17  ;;  %1756 = vst.msk [vmem:[%s4892_s1 + $0x698] sm:$0xff] %vm1544_vm0, %v792_v17  ;;  %1101 = vperm.xlu1 %2063, %v175_v15   ;;  %1096 = vperm.xlu0 %2062, %v174_v16   ;;  %v207_v15 = vld [vmem:[%s4891_s0 + $0x638] sm:$0xff]  ;;  %v206_v16 = vld [vmem:[%s4891_s0 + $0x630] sm:$0xff] }
 0x14f   :  { %1753 = vst.msk [vmem:[%s4892_s1 + $0x680] sm:$0xff] %vm1544_vm0, %v787_v18  ;;  %1755 = vst.msk [vmem:[%s4892_s1 + $0x690] sm:$0xff] %vm1544_vm0, %v787_v18 }
 0x151   :  { %v802_v21 = vpop.permute.xlu1 %801  ;;  %v797_v22 = vpop.permute.xlu0 %796 }
 0x152   :  { %1758 = vst.msk [vmem:[%s4892_s1 + $0x6a8] sm:$0xff] %vm1544_vm0, %v802_v21  ;;  %1760 = vst.msk [vmem:[%s4892_s1 + $0x6b8] sm:$0xff] %vm1544_vm0, %v802_v21  ;;  %1111 = vperm.xlu1 %2063, %v177_v19   ;;  %1106 = vperm.xlu0 %2062, %v176_v20   ;;  %v209_v19 = vld [vmem:[%s4891_s0 + $0x648] sm:$0xff]  ;;  %v208_v20 = vld [vmem:[%s4891_s0 + $0x640] sm:$0xff] }
 0x153   :  { %1757 = vst.msk [vmem:[%s4892_s1 + $0x6a0] sm:$0xff] %vm1544_vm0, %v797_v22  ;;  %1759 = vst.msk [vmem:[%s4892_s1 + $0x6b0] sm:$0xff] %vm1544_vm0, %v797_v22 }
 0x155   :  { %v812_v25 = vpop.permute.xlu1 %811  ;;  %v807_v26 = vpop.permute.xlu0 %806 }
 0x156   :  { %1762 = vst.msk [vmem:[%s4892_s1 + $0x6c8] sm:$0xff] %vm1544_vm0, %v812_v25  ;;  %1764 = vst.msk [vmem:[%s4892_s1 + $0x6d8] sm:$0xff] %vm1544_vm0, %v812_v25  ;;  %1121 = vperm.xlu1 %2063, %v179_v23   ;;  %1116 = vperm.xlu0 %2062, %v178_v24   ;;  %v211_v23 = vld [vmem:[%s4891_s0 + $0x658] sm:$0xff]  ;;  %v210_v24 = vld [vmem:[%s4891_s0 + $0x650] sm:$0xff] }
 0x157   :  { %1761 = vst.msk [vmem:[%s4892_s1 + $0x6c0] sm:$0xff] %vm1544_vm0, %v807_v26  ;;  %1763 = vst.msk [vmem:[%s4892_s1 + $0x6d0] sm:$0xff] %vm1544_vm0, %v807_v26 }
 0x159   :  { %v822_v29 = vpop.permute.xlu1 %821  ;;  %v817_v30 = vpop.permute.xlu0 %816 }
 0x15a   :  { %1766 = vst.msk [vmem:[%s4892_s1 + $0x6e8] sm:$0xff] %vm1544_vm0, %v822_v29  ;;  %1768 = vst.msk [vmem:[%s4892_s1 + $0x6f8] sm:$0xff] %vm1544_vm0, %v822_v29  ;;  %1131 = vperm.xlu1 %2063, %v181_v27   ;;  %1126 = vperm.xlu0 %2062, %v180_v28   ;;  %v213_v27 = vld [vmem:[%s4891_s0 + $0x668] sm:$0xff]  ;;  %v212_v28 = vld [vmem:[%s4891_s0 + $0x660] sm:$0xff] }
 0x15b   :  { %1765 = vst.msk [vmem:[%s4892_s1 + $0x6e0] sm:$0xff] %vm1544_vm0, %v817_v30  ;;  %1767 = vst.msk [vmem:[%s4892_s1 + $0x6f0] sm:$0xff] %vm1544_vm0, %v817_v30 }
 0x15d   :  { %v832_v33 = vpop.permute.xlu1 %831  ;;  %v827_v34 = vpop.permute.xlu0 %826 }
 0x15e   :  { %1770 = vst.msk [vmem:[%s4892_s1 + $0x708] sm:$0xff] %vm1544_vm0, %v832_v33  ;;  %1772 = vst.msk [vmem:[%s4892_s1 + $0x718] sm:$0xff] %vm1544_vm0, %v832_v33  ;;  %1141 = vperm.xlu1 %2063, %v183_v31   ;;  %1136 = vperm.xlu0 %2062, %v182_v32   ;;  %v215_v31 = vld [vmem:[%s4891_s0 + $0x678] sm:$0xff]  ;;  %v214_v32 = vld [vmem:[%s4891_s0 + $0x670] sm:$0xff] }
 0x15f   :  { %1769 = vst.msk [vmem:[%s4892_s1 + $0x700] sm:$0xff] %vm1544_vm0, %v827_v34  ;;  %1771 = vst.msk [vmem:[%s4892_s1 + $0x710] sm:$0xff] %vm1544_vm0, %v827_v34 }
 0x161   :  { %v842_v37 = vpop.permute.xlu1 %841  ;;  %v837_v38 = vpop.permute.xlu0 %836 }
 0x162   :  { %1774 = vst.msk [vmem:[%s4892_s1 + $0x728] sm:$0xff] %vm1544_vm0, %v842_v37  ;;  %1776 = vst.msk [vmem:[%s4892_s1 + $0x738] sm:$0xff] %vm1544_vm0, %v842_v37  ;;  %1151 = vperm.xlu1 %2063, %v185_v35   ;;  %1146 = vperm.xlu0 %2062, %v184_v36   ;;  %v217_v35 = vld [vmem:[%s4891_s0 + $0x688] sm:$0xff]  ;;  %v216_v36 = vld [vmem:[%s4891_s0 + $0x680] sm:$0xff] }
 0x163   :  { %1773 = vst.msk [vmem:[%s4892_s1 + $0x720] sm:$0xff] %vm1544_vm0, %v837_v38  ;;  %1775 = vst.msk [vmem:[%s4892_s1 + $0x730] sm:$0xff] %vm1544_vm0, %v837_v38 }
 0x165   :  { %v852_v41 = vpop.permute.xlu1 %851  ;;  %v847_v42 = vpop.permute.xlu0 %846 }
 0x166   :  { %1778 = vst.msk [vmem:[%s4892_s1 + $0x748] sm:$0xff] %vm1544_vm0, %v852_v41  ;;  %1780 = vst.msk [vmem:[%s4892_s1 + $0x758] sm:$0xff] %vm1544_vm0, %v852_v41  ;;  %1161 = vperm.xlu1 %2063, %v187_v39   ;;  %1156 = vperm.xlu0 %2062, %v186_v40   ;;  %v219_v39 = vld [vmem:[%s4891_s0 + $0x698] sm:$0xff]  ;;  %v218_v40 = vld [vmem:[%s4891_s0 + $0x690] sm:$0xff] }
 0x167   :  { %1777 = vst.msk [vmem:[%s4892_s1 + $0x740] sm:$0xff] %vm1544_vm0, %v847_v42  ;;  %1779 = vst.msk [vmem:[%s4892_s1 + $0x750] sm:$0xff] %vm1544_vm0, %v847_v42 }
 0x169   :  { %v862_v45 = vpop.permute.xlu1 %861  ;;  %v857_v46 = vpop.permute.xlu0 %856 }
 0x16a   :  { %1782 = vst.msk [vmem:[%s4892_s1 + $0x768] sm:$0xff] %vm1544_vm0, %v862_v45  ;;  %1784 = vst.msk [vmem:[%s4892_s1 + $0x778] sm:$0xff] %vm1544_vm0, %v862_v45  ;;  %1171 = vperm.xlu1 %2063, %v189_v43   ;;  %1166 = vperm.xlu0 %2062, %v188_v44   ;;  %v221_v43 = vld [vmem:[%s4891_s0 + $0x6a8] sm:$0xff]  ;;  %v220_v44 = vld [vmem:[%s4891_s0 + $0x6a0] sm:$0xff] }
 0x16b   :  { %1781 = vst.msk [vmem:[%s4892_s1 + $0x760] sm:$0xff] %vm1544_vm0, %v857_v46  ;;  %1783 = vst.msk [vmem:[%s4892_s1 + $0x770] sm:$0xff] %vm1544_vm0, %v857_v46 }
 0x16d   :  { %v872_v49 = vpop.permute.xlu1 %871  ;;  %v867_v50 = vpop.permute.xlu0 %866 }
 0x16e   :  { %1786 = vst.msk [vmem:[%s4892_s1 + $0x788] sm:$0xff] %vm1544_vm0, %v872_v49  ;;  %1788 = vst.msk [vmem:[%s4892_s1 + $0x798] sm:$0xff] %vm1544_vm0, %v872_v49  ;;  %1181 = vperm.xlu1 %2063, %v191_v47   ;;  %1176 = vperm.xlu0 %2062, %v190_v48   ;;  %v223_v47 = vld [vmem:[%s4891_s0 + $0x6b8] sm:$0xff]  ;;  %v222_v48 = vld [vmem:[%s4891_s0 + $0x6b0] sm:$0xff] }
 0x16f   :  { %1785 = vst.msk [vmem:[%s4892_s1 + $0x780] sm:$0xff] %vm1544_vm0, %v867_v50  ;;  %1787 = vst.msk [vmem:[%s4892_s1 + $0x790] sm:$0xff] %vm1544_vm0, %v867_v50 }
 0x171   :  { %v882_v53 = vpop.permute.xlu1 %881  ;;  %v877_v54 = vpop.permute.xlu0 %876 }
 0x172   :  { %1790 = vst.msk [vmem:[%s4892_s1 + $0x7a8] sm:$0xff] %vm1544_vm0, %v882_v53  ;;  %1792 = vst.msk [vmem:[%s4892_s1 + $0x7b8] sm:$0xff] %vm1544_vm0, %v882_v53  ;;  %1191 = vperm.xlu1 %2063, %v193_v51   ;;  %1186 = vperm.xlu0 %2062, %v192_v52   ;;  %v225_v51 = vld [vmem:[%s4891_s0 + $0x6c8] sm:$0xff]  ;;  %v224_v52 = vld [vmem:[%s4891_s0 + $0x6c0] sm:$0xff] }
 0x173   :  { %1789 = vst.msk [vmem:[%s4892_s1 + $0x7a0] sm:$0xff] %vm1544_vm0, %v877_v54  ;;  %1791 = vst.msk [vmem:[%s4892_s1 + $0x7b0] sm:$0xff] %vm1544_vm0, %v877_v54 }
 0x175   :  { %v892_v57 = vpop.permute.xlu1 %891  ;;  %v887_v58 = vpop.permute.xlu0 %886 }
 0x176   :  { %1794 = vst.msk [vmem:[%s4892_s1 + $0x7c8] sm:$0xff] %vm1544_vm0, %v892_v57  ;;  %1796 = vst.msk [vmem:[%s4892_s1 + $0x7d8] sm:$0xff] %vm1544_vm0, %v892_v57  ;;  %1201 = vperm.xlu1 %2063, %v195_v55   ;;  %1196 = vperm.xlu0 %2062, %v194_v56   ;;  %v227_v55 = vld [vmem:[%s4891_s0 + $0x6d8] sm:$0xff]  ;;  %v226_v56 = vld [vmem:[%s4891_s0 + $0x6d0] sm:$0xff] }
 0x177   :  { %1793 = vst.msk [vmem:[%s4892_s1 + $0x7c0] sm:$0xff] %vm1544_vm0, %v887_v58  ;;  %1795 = vst.msk [vmem:[%s4892_s1 + $0x7d0] sm:$0xff] %vm1544_vm0, %v887_v58 }
 0x179   :  { %v902_v61 = vpop.permute.xlu1 %901  ;;  %v897_v62 = vpop.permute.xlu0 %896 }
 0x17a   :  { %1798 = vst.msk [vmem:[%s4892_s1 + $0x7e8] sm:$0xff] %vm1544_vm0, %v902_v61  ;;  %1800 = vst.msk [vmem:[%s4892_s1 + $0x7f8] sm:$0xff] %vm1544_vm0, %v902_v61  ;;  %1211 = vperm.xlu1 %2063, %v197_v59   ;;  %1206 = vperm.xlu0 %2062, %v196_v60   ;;  %v229_v59 = vld [vmem:[%s4891_s0 + $0x6e8] sm:$0xff]  ;;  %v228_v60 = vld [vmem:[%s4891_s0 + $0x6e0] sm:$0xff] }
 0x17b   :  { %1797 = vst.msk [vmem:[%s4892_s1 + $0x7e0] sm:$0xff] %vm1544_vm0, %v897_v62  ;;  %1799 = vst.msk [vmem:[%s4892_s1 + $0x7f0] sm:$0xff] %vm1544_vm0, %v897_v62 }
 0x17d   :  { %v912_v1 = vpop.permute.xlu1 %911  ;;  %v907_v2 = vpop.permute.xlu0 %906 }
 0x17e   :  { %1802 = vst.msk [vmem:[%s4892_s1 + $0x808] sm:$0xff] %vm1544_vm0, %v912_v1  ;;  %1804 = vst.msk [vmem:[%s4892_s1 + $0x818] sm:$0xff] %vm1544_vm0, %v912_v1  ;;  %1221 = vperm.xlu1 %2063, %v199_v63   ;;  %1216 = vperm.xlu0 %2062, %v198_v0   ;;  %v231_v63 = vld [vmem:[%s4891_s0 + $0x6f8] sm:$0xff]  ;;  %v230_v0 = vld [vmem:[%s4891_s0 + $0x6f0] sm:$0xff] }
 0x17f   :  { %1801 = vst.msk [vmem:[%s4892_s1 + $0x800] sm:$0xff] %vm1544_vm0, %v907_v2  ;;  %1803 = vst.msk [vmem:[%s4892_s1 + $0x810] sm:$0xff] %vm1544_vm0, %v907_v2 }
 0x181   :  { %v922_v5 = vpop.permute.xlu1 %921  ;;  %v917_v6 = vpop.permute.xlu0 %916 }
 0x182   :  { %1806 = vst.msk [vmem:[%s4892_s1 + $0x828] sm:$0xff] %vm1544_vm0, %v922_v5  ;;  %1808 = vst.msk [vmem:[%s4892_s1 + $0x838] sm:$0xff] %vm1544_vm0, %v922_v5  ;;  %1231 = vperm.xlu1 %2063, %v201_v3   ;;  %1226 = vperm.xlu0 %2062, %v200_v4   ;;  %v233_v3 = vld [vmem:[%s4891_s0 + $0x708] sm:$0xff]  ;;  %v232_v4 = vld [vmem:[%s4891_s0 + $0x700] sm:$0xff] }
 0x183   :  { %1805 = vst.msk [vmem:[%s4892_s1 + $0x820] sm:$0xff] %vm1544_vm0, %v917_v6  ;;  %1807 = vst.msk [vmem:[%s4892_s1 + $0x830] sm:$0xff] %vm1544_vm0, %v917_v6 }
 0x185   :  { %v932_v9 = vpop.permute.xlu1 %931  ;;  %v927_v10 = vpop.permute.xlu0 %926 }
 0x186   :  { %1810 = vst.msk [vmem:[%s4892_s1 + $0x848] sm:$0xff] %vm1544_vm0, %v932_v9  ;;  %1812 = vst.msk [vmem:[%s4892_s1 + $0x858] sm:$0xff] %vm1544_vm0, %v932_v9  ;;  %1241 = vperm.xlu1 %2063, %v203_v7   ;;  %1236 = vperm.xlu0 %2062, %v202_v8   ;;  %v235_v7 = vld [vmem:[%s4891_s0 + $0x718] sm:$0xff]  ;;  %v234_v8 = vld [vmem:[%s4891_s0 + $0x710] sm:$0xff] }
 0x187   :  { %1809 = vst.msk [vmem:[%s4892_s1 + $0x840] sm:$0xff] %vm1544_vm0, %v927_v10  ;;  %1811 = vst.msk [vmem:[%s4892_s1 + $0x850] sm:$0xff] %vm1544_vm0, %v927_v10 }
 0x189   :  { %v942_v13 = vpop.permute.xlu1 %941  ;;  %v937_v14 = vpop.permute.xlu0 %936 }
 0x18a   :  { %1814 = vst.msk [vmem:[%s4892_s1 + $0x868] sm:$0xff] %vm1544_vm0, %v942_v13  ;;  %1816 = vst.msk [vmem:[%s4892_s1 + $0x878] sm:$0xff] %vm1544_vm0, %v942_v13  ;;  %1251 = vperm.xlu1 %2063, %v205_v11   ;;  %1246 = vperm.xlu0 %2062, %v204_v12   ;;  %v237_v11 = vld [vmem:[%s4891_s0 + $0x728] sm:$0xff]  ;;  %v236_v12 = vld [vmem:[%s4891_s0 + $0x720] sm:$0xff] }
 0x18b   :  { %1813 = vst.msk [vmem:[%s4892_s1 + $0x860] sm:$0xff] %vm1544_vm0, %v937_v14  ;;  %1815 = vst.msk [vmem:[%s4892_s1 + $0x870] sm:$0xff] %vm1544_vm0, %v937_v14 }
 0x18d   :  { %v952_v17 = vpop.permute.xlu1 %951  ;;  %v947_v18 = vpop.permute.xlu0 %946 }
 0x18e   :  { %1818 = vst.msk [vmem:[%s4892_s1 + $0x888] sm:$0xff] %vm1544_vm0, %v952_v17  ;;  %1820 = vst.msk [vmem:[%s4892_s1 + $0x898] sm:$0xff] %vm1544_vm0, %v952_v17  ;;  %1261 = vperm.xlu1 %2063, %v207_v15   ;;  %1256 = vperm.xlu0 %2062, %v206_v16   ;;  %v239_v15 = vld [vmem:[%s4891_s0 + $0x738] sm:$0xff]  ;;  %v238_v16 = vld [vmem:[%s4891_s0 + $0x730] sm:$0xff] }
 0x18f   :  { %1817 = vst.msk [vmem:[%s4892_s1 + $0x880] sm:$0xff] %vm1544_vm0, %v947_v18  ;;  %1819 = vst.msk [vmem:[%s4892_s1 + $0x890] sm:$0xff] %vm1544_vm0, %v947_v18 }
 0x191   :  { %v962_v21 = vpop.permute.xlu1 %961  ;;  %v957_v22 = vpop.permute.xlu0 %956 }
 0x192   :  { %1822 = vst.msk [vmem:[%s4892_s1 + $0x8a8] sm:$0xff] %vm1544_vm0, %v962_v21  ;;  %1824 = vst.msk [vmem:[%s4892_s1 + $0x8b8] sm:$0xff] %vm1544_vm0, %v962_v21  ;;  %1271 = vperm.xlu1 %2063, %v209_v19   ;;  %1266 = vperm.xlu0 %2062, %v208_v20   ;;  %v241_v19 = vld [vmem:[%s4891_s0 + $0x748] sm:$0xff]  ;;  %v240_v20 = vld [vmem:[%s4891_s0 + $0x740] sm:$0xff] }
 0x193   :  { %1821 = vst.msk [vmem:[%s4892_s1 + $0x8a0] sm:$0xff] %vm1544_vm0, %v957_v22  ;;  %1823 = vst.msk [vmem:[%s4892_s1 + $0x8b0] sm:$0xff] %vm1544_vm0, %v957_v22 }
 0x195   :  { %v972_v25 = vpop.permute.xlu1 %971  ;;  %v967_v26 = vpop.permute.xlu0 %966 }
 0x196   :  { %1826 = vst.msk [vmem:[%s4892_s1 + $0x8c8] sm:$0xff] %vm1544_vm0, %v972_v25  ;;  %1828 = vst.msk [vmem:[%s4892_s1 + $0x8d8] sm:$0xff] %vm1544_vm0, %v972_v25  ;;  %1281 = vperm.xlu1 %2063, %v211_v23   ;;  %1276 = vperm.xlu0 %2062, %v210_v24   ;;  %v243_v23 = vld [vmem:[%s4891_s0 + $0x758] sm:$0xff]  ;;  %v242_v24 = vld [vmem:[%s4891_s0 + $0x750] sm:$0xff] }
 0x197   :  { %1825 = vst.msk [vmem:[%s4892_s1 + $0x8c0] sm:$0xff] %vm1544_vm0, %v967_v26  ;;  %1827 = vst.msk [vmem:[%s4892_s1 + $0x8d0] sm:$0xff] %vm1544_vm0, %v967_v26 }
 0x199   :  { %v982_v29 = vpop.permute.xlu1 %981  ;;  %v977_v30 = vpop.permute.xlu0 %976 }
 0x19a   :  { %1830 = vst.msk [vmem:[%s4892_s1 + $0x8e8] sm:$0xff] %vm1544_vm0, %v982_v29  ;;  %1832 = vst.msk [vmem:[%s4892_s1 + $0x8f8] sm:$0xff] %vm1544_vm0, %v982_v29  ;;  %1291 = vperm.xlu1 %2063, %v213_v27   ;;  %1286 = vperm.xlu0 %2062, %v212_v28   ;;  %v245_v27 = vld [vmem:[%s4891_s0 + $0x768] sm:$0xff]  ;;  %v244_v28 = vld [vmem:[%s4891_s0 + $0x760] sm:$0xff] }
 0x19b   :  { %1829 = vst.msk [vmem:[%s4892_s1 + $0x8e0] sm:$0xff] %vm1544_vm0, %v977_v30  ;;  %1831 = vst.msk [vmem:[%s4892_s1 + $0x8f0] sm:$0xff] %vm1544_vm0, %v977_v30 }
 0x19d   :  { %v992_v33 = vpop.permute.xlu1 %991  ;;  %v987_v34 = vpop.permute.xlu0 %986 }
 0x19e   :  { %1834 = vst.msk [vmem:[%s4892_s1 + $0x908] sm:$0xff] %vm1544_vm0, %v992_v33  ;;  %1836 = vst.msk [vmem:[%s4892_s1 + $0x918] sm:$0xff] %vm1544_vm0, %v992_v33  ;;  %1301 = vperm.xlu1 %2063, %v215_v31   ;;  %1296 = vperm.xlu0 %2062, %v214_v32   ;;  %v247_v31 = vld [vmem:[%s4891_s0 + $0x778] sm:$0xff]  ;;  %v246_v32 = vld [vmem:[%s4891_s0 + $0x770] sm:$0xff] }
 0x19f   :  { %1833 = vst.msk [vmem:[%s4892_s1 + $0x900] sm:$0xff] %vm1544_vm0, %v987_v34  ;;  %1835 = vst.msk [vmem:[%s4892_s1 + $0x910] sm:$0xff] %vm1544_vm0, %v987_v34 }
 0x1a1   :  { %v1002_v37 = vpop.permute.xlu1 %1001  ;;  %v997_v38 = vpop.permute.xlu0 %996 }
 0x1a2   :  { %1838 = vst.msk [vmem:[%s4892_s1 + $0x928] sm:$0xff] %vm1544_vm0, %v1002_v37  ;;  %1840 = vst.msk [vmem:[%s4892_s1 + $0x938] sm:$0xff] %vm1544_vm0, %v1002_v37  ;;  %1311 = vperm.xlu1 %2063, %v217_v35   ;;  %1306 = vperm.xlu0 %2062, %v216_v36   ;;  %v249_v35 = vld [vmem:[%s4891_s0 + $0x788] sm:$0xff]  ;;  %v248_v36 = vld [vmem:[%s4891_s0 + $0x780] sm:$0xff] }
 0x1a3   :  { %1837 = vst.msk [vmem:[%s4892_s1 + $0x920] sm:$0xff] %vm1544_vm0, %v997_v38  ;;  %1839 = vst.msk [vmem:[%s4892_s1 + $0x930] sm:$0xff] %vm1544_vm0, %v997_v38 }
 0x1a5   :  { %v1012_v41 = vpop.permute.xlu1 %1011  ;;  %v1007_v42 = vpop.permute.xlu0 %1006 }
 0x1a6   :  { %1842 = vst.msk [vmem:[%s4892_s1 + $0x948] sm:$0xff] %vm1544_vm0, %v1012_v41  ;;  %1844 = vst.msk [vmem:[%s4892_s1 + $0x958] sm:$0xff] %vm1544_vm0, %v1012_v41  ;;  %1321 = vperm.xlu1 %2063, %v219_v39   ;;  %1316 = vperm.xlu0 %2062, %v218_v40   ;;  %v251_v39 = vld [vmem:[%s4891_s0 + $0x798] sm:$0xff]  ;;  %v250_v40 = vld [vmem:[%s4891_s0 + $0x790] sm:$0xff] }
 0x1a7   :  { %1841 = vst.msk [vmem:[%s4892_s1 + $0x940] sm:$0xff] %vm1544_vm0, %v1007_v42  ;;  %1843 = vst.msk [vmem:[%s4892_s1 + $0x950] sm:$0xff] %vm1544_vm0, %v1007_v42 }
 0x1a9   :  { %v1022_v45 = vpop.permute.xlu1 %1021  ;;  %v1017_v46 = vpop.permute.xlu0 %1016 }
 0x1aa   :  { %1846 = vst.msk [vmem:[%s4892_s1 + $0x968] sm:$0xff] %vm1544_vm0, %v1022_v45  ;;  %1848 = vst.msk [vmem:[%s4892_s1 + $0x978] sm:$0xff] %vm1544_vm0, %v1022_v45  ;;  %1331 = vperm.xlu1 %2063, %v221_v43   ;;  %1326 = vperm.xlu0 %2062, %v220_v44   ;;  %v253_v43 = vld [vmem:[%s4891_s0 + $0x7a8] sm:$0xff]  ;;  %v252_v44 = vld [vmem:[%s4891_s0 + $0x7a0] sm:$0xff] }
 0x1ab   :  { %1845 = vst.msk [vmem:[%s4892_s1 + $0x960] sm:$0xff] %vm1544_vm0, %v1017_v46  ;;  %1847 = vst.msk [vmem:[%s4892_s1 + $0x970] sm:$0xff] %vm1544_vm0, %v1017_v46 }
 0x1ad   :  { %v1032_v49 = vpop.permute.xlu1 %1031  ;;  %v1027_v50 = vpop.permute.xlu0 %1026 }
 0x1ae   :  { %1850 = vst.msk [vmem:[%s4892_s1 + $0x988] sm:$0xff] %vm1544_vm0, %v1032_v49  ;;  %1852 = vst.msk [vmem:[%s4892_s1 + $0x998] sm:$0xff] %vm1544_vm0, %v1032_v49  ;;  %1341 = vperm.xlu1 %2063, %v223_v47   ;;  %1336 = vperm.xlu0 %2062, %v222_v48   ;;  %v255_v47 = vld [vmem:[%s4891_s0 + $0x7b8] sm:$0xff]  ;;  %v254_v48 = vld [vmem:[%s4891_s0 + $0x7b0] sm:$0xff] }
 0x1af   :  { %1849 = vst.msk [vmem:[%s4892_s1 + $0x980] sm:$0xff] %vm1544_vm0, %v1027_v50  ;;  %1851 = vst.msk [vmem:[%s4892_s1 + $0x990] sm:$0xff] %vm1544_vm0, %v1027_v50 }
 0x1b1   :  { %v1042_v53 = vpop.permute.xlu1 %1041  ;;  %v1037_v54 = vpop.permute.xlu0 %1036 }
 0x1b2   :  { %1854 = vst.msk [vmem:[%s4892_s1 + $0x9a8] sm:$0xff] %vm1544_vm0, %v1042_v53  ;;  %1856 = vst.msk [vmem:[%s4892_s1 + $0x9b8] sm:$0xff] %vm1544_vm0, %v1042_v53  ;;  %1351 = vperm.xlu1 %2063, %v225_v51   ;;  %1346 = vperm.xlu0 %2062, %v224_v52   ;;  %v257_v51 = vld [vmem:[%s4891_s0 + $0x7c8] sm:$0xff]  ;;  %v256_v52 = vld [vmem:[%s4891_s0 + $0x7c0] sm:$0xff] }
 0x1b3   :  { %1853 = vst.msk [vmem:[%s4892_s1 + $0x9a0] sm:$0xff] %vm1544_vm0, %v1037_v54  ;;  %1855 = vst.msk [vmem:[%s4892_s1 + $0x9b0] sm:$0xff] %vm1544_vm0, %v1037_v54 }
 0x1b5   :  { %v1052_v57 = vpop.permute.xlu1 %1051  ;;  %v1047_v58 = vpop.permute.xlu0 %1046 }
 0x1b6   :  { %1858 = vst.msk [vmem:[%s4892_s1 + $0x9c8] sm:$0xff] %vm1544_vm0, %v1052_v57  ;;  %1860 = vst.msk [vmem:[%s4892_s1 + $0x9d8] sm:$0xff] %vm1544_vm0, %v1052_v57  ;;  %1361 = vperm.xlu1 %2063, %v227_v55   ;;  %1356 = vperm.xlu0 %2062, %v226_v56   ;;  %v259_v55 = vld [vmem:[%s4891_s0 + $0x7d8] sm:$0xff]  ;;  %v258_v56 = vld [vmem:[%s4891_s0 + $0x7d0] sm:$0xff] }
 0x1b7   :  { %1857 = vst.msk [vmem:[%s4892_s1 + $0x9c0] sm:$0xff] %vm1544_vm0, %v1047_v58  ;;  %1859 = vst.msk [vmem:[%s4892_s1 + $0x9d0] sm:$0xff] %vm1544_vm0, %v1047_v58 }
 0x1b9   :  { %v1062_v61 = vpop.permute.xlu1 %1061  ;;  %v1057_v62 = vpop.permute.xlu0 %1056 }
 0x1ba   :  { %1862 = vst.msk [vmem:[%s4892_s1 + $0x9e8] sm:$0xff] %vm1544_vm0, %v1062_v61  ;;  %1864 = vst.msk [vmem:[%s4892_s1 + $0x9f8] sm:$0xff] %vm1544_vm0, %v1062_v61  ;;  %1371 = vperm.xlu1 %2063, %v229_v59   ;;  %1366 = vperm.xlu0 %2062, %v228_v60   ;;  %v261_v59 = vld [vmem:[%s4891_s0 + $0x7e8] sm:$0xff]  ;;  %v260_v60 = vld [vmem:[%s4891_s0 + $0x7e0] sm:$0xff] }
 0x1bb   :  { %1861 = vst.msk [vmem:[%s4892_s1 + $0x9e0] sm:$0xff] %vm1544_vm0, %v1057_v62  ;;  %1863 = vst.msk [vmem:[%s4892_s1 + $0x9f0] sm:$0xff] %vm1544_vm0, %v1057_v62 }
 0x1bd   :  { %v1072_v1 = vpop.permute.xlu1 %1071  ;;  %v1067_v2 = vpop.permute.xlu0 %1066 }
 0x1be   :  { %1866 = vst.msk [vmem:[%s4892_s1 + $0xa08] sm:$0xff] %vm1544_vm0, %v1072_v1  ;;  %1868 = vst.msk [vmem:[%s4892_s1 + $0xa18] sm:$0xff] %vm1544_vm0, %v1072_v1  ;;  %1381 = vperm.xlu1 %2063, %v231_v63   ;;  %1376 = vperm.xlu0 %2062, %v230_v0   ;;  %v263_v63 = vld [vmem:[%s4891_s0 + $0x7f8] sm:$0xff]  ;;  %v262_v0 = vld [vmem:[%s4891_s0 + $0x7f0] sm:$0xff] }
 0x1bf   :  { %1865 = vst.msk [vmem:[%s4892_s1 + $0xa00] sm:$0xff] %vm1544_vm0, %v1067_v2  ;;  %1867 = vst.msk [vmem:[%s4892_s1 + $0xa10] sm:$0xff] %vm1544_vm0, %v1067_v2 }
 0x1c1   :  { %v1082_v5 = vpop.permute.xlu1 %1081  ;;  %v1077_v6 = vpop.permute.xlu0 %1076 }
 0x1c2   :  { %1870 = vst.msk [vmem:[%s4892_s1 + $0xa28] sm:$0xff] %vm1544_vm0, %v1082_v5  ;;  %1872 = vst.msk [vmem:[%s4892_s1 + $0xa38] sm:$0xff] %vm1544_vm0, %v1082_v5  ;;  %1391 = vperm.xlu1 %2063, %v233_v3   ;;  %1386 = vperm.xlu0 %2062, %v232_v4  }
 0x1c3   :  { %1869 = vst.msk [vmem:[%s4892_s1 + $0xa20] sm:$0xff] %vm1544_vm0, %v1077_v6  ;;  %1871 = vst.msk [vmem:[%s4892_s1 + $0xa30] sm:$0xff] %vm1544_vm0, %v1077_v6 }
 0x1c5   :  { %v1092_v9 = vpop.permute.xlu1 %1091  ;;  %v1087_v10 = vpop.permute.xlu0 %1086 }
 0x1c6   :  { %1874 = vst.msk [vmem:[%s4892_s1 + $0xa48] sm:$0xff] %vm1544_vm0, %v1092_v9  ;;  %1876 = vst.msk [vmem:[%s4892_s1 + $0xa58] sm:$0xff] %vm1544_vm0, %v1092_v9  ;;  %1401 = vperm.xlu1 %2063, %v235_v7   ;;  %1396 = vperm.xlu0 %2062, %v234_v8  }
 0x1c7   :  { %1873 = vst.msk [vmem:[%s4892_s1 + $0xa40] sm:$0xff] %vm1544_vm0, %v1087_v10  ;;  %1875 = vst.msk [vmem:[%s4892_s1 + $0xa50] sm:$0xff] %vm1544_vm0, %v1087_v10 }
 0x1c9   :  { %v1102_v13 = vpop.permute.xlu1 %1101  ;;  %v1097_v14 = vpop.permute.xlu0 %1096 }
 0x1ca   :  { %1878 = vst.msk [vmem:[%s4892_s1 + $0xa68] sm:$0xff] %vm1544_vm0, %v1102_v13  ;;  %1880 = vst.msk [vmem:[%s4892_s1 + $0xa78] sm:$0xff] %vm1544_vm0, %v1102_v13  ;;  %1411 = vperm.xlu1 %2063, %v237_v11   ;;  %1406 = vperm.xlu0 %2062, %v236_v12  }
 0x1cb   :  { %1877 = vst.msk [vmem:[%s4892_s1 + $0xa60] sm:$0xff] %vm1544_vm0, %v1097_v14  ;;  %1879 = vst.msk [vmem:[%s4892_s1 + $0xa70] sm:$0xff] %vm1544_vm0, %v1097_v14 }
 0x1cd   :  { %v1112_v17 = vpop.permute.xlu1 %1111  ;;  %v1107_v18 = vpop.permute.xlu0 %1106 }
 0x1ce   :  { %1882 = vst.msk [vmem:[%s4892_s1 + $0xa88] sm:$0xff] %vm1544_vm0, %v1112_v17  ;;  %1884 = vst.msk [vmem:[%s4892_s1 + $0xa98] sm:$0xff] %vm1544_vm0, %v1112_v17  ;;  %1421 = vperm.xlu1 %2063, %v239_v15   ;;  %1416 = vperm.xlu0 %2062, %v238_v16  }
 0x1cf   :  { %1881 = vst.msk [vmem:[%s4892_s1 + $0xa80] sm:$0xff] %vm1544_vm0, %v1107_v18  ;;  %1883 = vst.msk [vmem:[%s4892_s1 + $0xa90] sm:$0xff] %vm1544_vm0, %v1107_v18 }
 0x1d1   :  { %v1122_v21 = vpop.permute.xlu1 %1121  ;;  %v1117_v22 = vpop.permute.xlu0 %1116 }
 0x1d2   :  { %1886 = vst.msk [vmem:[%s4892_s1 + $0xaa8] sm:$0xff] %vm1544_vm0, %v1122_v21  ;;  %1888 = vst.msk [vmem:[%s4892_s1 + $0xab8] sm:$0xff] %vm1544_vm0, %v1122_v21  ;;  %1431 = vperm.xlu1 %2063, %v241_v19   ;;  %1426 = vperm.xlu0 %2062, %v240_v20  }
 0x1d3   :  { %1885 = vst.msk [vmem:[%s4892_s1 + $0xaa0] sm:$0xff] %vm1544_vm0, %v1117_v22  ;;  %1887 = vst.msk [vmem:[%s4892_s1 + $0xab0] sm:$0xff] %vm1544_vm0, %v1117_v22 }
 0x1d5   :  { %v1132_v25 = vpop.permute.xlu1 %1131  ;;  %v1127_v26 = vpop.permute.xlu0 %1126 }
 0x1d6   :  { %1890 = vst.msk [vmem:[%s4892_s1 + $0xac8] sm:$0xff] %vm1544_vm0, %v1132_v25  ;;  %1892 = vst.msk [vmem:[%s4892_s1 + $0xad8] sm:$0xff] %vm1544_vm0, %v1132_v25  ;;  %1441 = vperm.xlu1 %2063, %v243_v23   ;;  %1436 = vperm.xlu0 %2062, %v242_v24  }
 0x1d7   :  { %1889 = vst.msk [vmem:[%s4892_s1 + $0xac0] sm:$0xff] %vm1544_vm0, %v1127_v26  ;;  %1891 = vst.msk [vmem:[%s4892_s1 + $0xad0] sm:$0xff] %vm1544_vm0, %v1127_v26 }
 0x1d9   :  { %v1142_v29 = vpop.permute.xlu1 %1141  ;;  %v1137_v30 = vpop.permute.xlu0 %1136 }
 0x1da   :  { %1894 = vst.msk [vmem:[%s4892_s1 + $0xae8] sm:$0xff] %vm1544_vm0, %v1142_v29  ;;  %1896 = vst.msk [vmem:[%s4892_s1 + $0xaf8] sm:$0xff] %vm1544_vm0, %v1142_v29  ;;  %1451 = vperm.xlu1 %2063, %v245_v27   ;;  %1446 = vperm.xlu0 %2062, %v244_v28  }
 0x1db   :  { %1893 = vst.msk [vmem:[%s4892_s1 + $0xae0] sm:$0xff] %vm1544_vm0, %v1137_v30  ;;  %1895 = vst.msk [vmem:[%s4892_s1 + $0xaf0] sm:$0xff] %vm1544_vm0, %v1137_v30 }
 0x1dd   :  { %v1152_v33 = vpop.permute.xlu1 %1151  ;;  %v1147_v34 = vpop.permute.xlu0 %1146 }
 0x1de   :  { %1898 = vst.msk [vmem:[%s4892_s1 + $0xb08] sm:$0xff] %vm1544_vm0, %v1152_v33  ;;  %1900 = vst.msk [vmem:[%s4892_s1 + $0xb18] sm:$0xff] %vm1544_vm0, %v1152_v33  ;;  %1461 = vperm.xlu1 %2063, %v247_v31   ;;  %1456 = vperm.xlu0 %2062, %v246_v32  }
 0x1df   :  { %1897 = vst.msk [vmem:[%s4892_s1 + $0xb00] sm:$0xff] %vm1544_vm0, %v1147_v34  ;;  %1899 = vst.msk [vmem:[%s4892_s1 + $0xb10] sm:$0xff] %vm1544_vm0, %v1147_v34 }
 0x1e1   :  { %v1162_v37 = vpop.permute.xlu1 %1161  ;;  %v1157_v38 = vpop.permute.xlu0 %1156 }
 0x1e2   :  { %1902 = vst.msk [vmem:[%s4892_s1 + $0xb28] sm:$0xff] %vm1544_vm0, %v1162_v37  ;;  %1904 = vst.msk [vmem:[%s4892_s1 + $0xb38] sm:$0xff] %vm1544_vm0, %v1162_v37  ;;  %1471 = vperm.xlu1 %2063, %v249_v35   ;;  %1466 = vperm.xlu0 %2062, %v248_v36  }
 0x1e3   :  { %1901 = vst.msk [vmem:[%s4892_s1 + $0xb20] sm:$0xff] %vm1544_vm0, %v1157_v38  ;;  %1903 = vst.msk [vmem:[%s4892_s1 + $0xb30] sm:$0xff] %vm1544_vm0, %v1157_v38 }
 0x1e5   :  { %v1172_v41 = vpop.permute.xlu1 %1171  ;;  %v1167_v42 = vpop.permute.xlu0 %1166 }
 0x1e6   :  { %1906 = vst.msk [vmem:[%s4892_s1 + $0xb48] sm:$0xff] %vm1544_vm0, %v1172_v41  ;;  %1908 = vst.msk [vmem:[%s4892_s1 + $0xb58] sm:$0xff] %vm1544_vm0, %v1172_v41  ;;  %1481 = vperm.xlu1 %2063, %v251_v39   ;;  %1476 = vperm.xlu0 %2062, %v250_v40  }
 0x1e7   :  { %1905 = vst.msk [vmem:[%s4892_s1 + $0xb40] sm:$0xff] %vm1544_vm0, %v1167_v42  ;;  %1907 = vst.msk [vmem:[%s4892_s1 + $0xb50] sm:$0xff] %vm1544_vm0, %v1167_v42 }
 0x1e9   :  { %v1182_v45 = vpop.permute.xlu1 %1181  ;;  %v1177_v46 = vpop.permute.xlu0 %1176 }
 0x1ea   :  { %1910 = vst.msk [vmem:[%s4892_s1 + $0xb68] sm:$0xff] %vm1544_vm0, %v1182_v45  ;;  %1912 = vst.msk [vmem:[%s4892_s1 + $0xb78] sm:$0xff] %vm1544_vm0, %v1182_v45  ;;  %1491 = vperm.xlu1 %2063, %v253_v43   ;;  %1486 = vperm.xlu0 %2062, %v252_v44  }
 0x1eb   :  { %1909 = vst.msk [vmem:[%s4892_s1 + $0xb60] sm:$0xff] %vm1544_vm0, %v1177_v46  ;;  %1911 = vst.msk [vmem:[%s4892_s1 + $0xb70] sm:$0xff] %vm1544_vm0, %v1177_v46 }
 0x1ed   :  { %v1192_v49 = vpop.permute.xlu1 %1191  ;;  %v1187_v50 = vpop.permute.xlu0 %1186 }
 0x1ee   :  { %1914 = vst.msk [vmem:[%s4892_s1 + $0xb88] sm:$0xff] %vm1544_vm0, %v1192_v49  ;;  %1916 = vst.msk [vmem:[%s4892_s1 + $0xb98] sm:$0xff] %vm1544_vm0, %v1192_v49  ;;  %1501 = vperm.xlu1 %2063, %v255_v47   ;;  %1496 = vperm.xlu0 %2062, %v254_v48  }
 0x1ef   :  { %1913 = vst.msk [vmem:[%s4892_s1 + $0xb80] sm:$0xff] %vm1544_vm0, %v1187_v50  ;;  %1915 = vst.msk [vmem:[%s4892_s1 + $0xb90] sm:$0xff] %vm1544_vm0, %v1187_v50 }
 0x1f1   :  { %v1202_v53 = vpop.permute.xlu1 %1201  ;;  %v1197_v54 = vpop.permute.xlu0 %1196 }
 0x1f2   :  { %1918 = vst.msk [vmem:[%s4892_s1 + $0xba8] sm:$0xff] %vm1544_vm0, %v1202_v53  ;;  %1920 = vst.msk [vmem:[%s4892_s1 + $0xbb8] sm:$0xff] %vm1544_vm0, %v1202_v53  ;;  %1511 = vperm.xlu1 %2063, %v257_v51   ;;  %1506 = vperm.xlu0 %2062, %v256_v52  }
 0x1f3   :  { %1917 = vst.msk [vmem:[%s4892_s1 + $0xba0] sm:$0xff] %vm1544_vm0, %v1197_v54  ;;  %1919 = vst.msk [vmem:[%s4892_s1 + $0xbb0] sm:$0xff] %vm1544_vm0, %v1197_v54 }
 0x1f5   :  { %v1212_v57 = vpop.permute.xlu1 %1211  ;;  %v1207_v58 = vpop.permute.xlu0 %1206 }
 0x1f6   :  { %1922 = vst.msk [vmem:[%s4892_s1 + $0xbc8] sm:$0xff] %vm1544_vm0, %v1212_v57  ;;  %1924 = vst.msk [vmem:[%s4892_s1 + $0xbd8] sm:$0xff] %vm1544_vm0, %v1212_v57  ;;  %1521 = vperm.xlu1 %2063, %v259_v55   ;;  %1516 = vperm.xlu0 %2062, %v258_v56  }
 0x1f7   :  { %1921 = vst.msk [vmem:[%s4892_s1 + $0xbc0] sm:$0xff] %vm1544_vm0, %v1207_v58  ;;  %1923 = vst.msk [vmem:[%s4892_s1 + $0xbd0] sm:$0xff] %vm1544_vm0, %v1207_v58 }
 0x1f9   :  { %v1222_v61 = vpop.permute.xlu1 %1221  ;;  %v1217_v62 = vpop.permute.xlu0 %1216 }
 0x1fa   :  { %1926 = vst.msk [vmem:[%s4892_s1 + $0xbe8] sm:$0xff] %vm1544_vm0, %v1222_v61  ;;  %1928 = vst.msk [vmem:[%s4892_s1 + $0xbf8] sm:$0xff] %vm1544_vm0, %v1222_v61  ;;  %1531 = vperm.xlu1 %2063, %v261_v59   ;;  %1526 = vperm.xlu0 %2062, %v260_v60  }
 0x1fb   :  { %1925 = vst.msk [vmem:[%s4892_s1 + $0xbe0] sm:$0xff] %vm1544_vm0, %v1217_v62  ;;  %1927 = vst.msk [vmem:[%s4892_s1 + $0xbf0] sm:$0xff] %vm1544_vm0, %v1217_v62 }
 0x1fd   :  { %v1232_v1 = vpop.permute.xlu1 %1231  ;;  %v1227_v2 = vpop.permute.xlu0 %1226 }
 0x1fe   :  { %1930 = vst.msk [vmem:[%s4892_s1 + $0xc08] sm:$0xff] %vm1544_vm0, %v1232_v1  ;;  %1932 = vst.msk [vmem:[%s4892_s1 + $0xc18] sm:$0xff] %vm1544_vm0, %v1232_v1  ;;  %1541 = vperm.xlu1 %2063, %v263_v63   ;;  %1536 = vperm.xlu0 %2062, %v262_v0  }
 0x1ff   :  { %1929 = vst.msk [vmem:[%s4892_s1 + $0xc00] sm:$0xff] %vm1544_vm0, %v1227_v2  ;;  %1931 = vst.msk [vmem:[%s4892_s1 + $0xc10] sm:$0xff] %vm1544_vm0, %v1227_v2 }
 0x201   :  { %v1242_v3 = vpop.permute.xlu1 %1241  ;;  %v1237_v4 = vpop.permute.xlu0 %1236 }
 0x202   :  { %1934 = vst.msk [vmem:[%s4892_s1 + $0xc28] sm:$0xff] %vm1544_vm0, %v1242_v3  ;;  %1936 = vst.msk [vmem:[%s4892_s1 + $0xc38] sm:$0xff] %vm1544_vm0, %v1242_v3 }
 0x203   :  { %1933 = vst.msk [vmem:[%s4892_s1 + $0xc20] sm:$0xff] %vm1544_vm0, %v1237_v4  ;;  %1935 = vst.msk [vmem:[%s4892_s1 + $0xc30] sm:$0xff] %vm1544_vm0, %v1237_v4 }
 0x205   :  { %v1252_v5 = vpop.permute.xlu1 %1251  ;;  %v1247_v6 = vpop.permute.xlu0 %1246 }
 0x206   :  { %1938 = vst.msk [vmem:[%s4892_s1 + $0xc48] sm:$0xff] %vm1544_vm0, %v1252_v5  ;;  %1940 = vst.msk [vmem:[%s4892_s1 + $0xc58] sm:$0xff] %vm1544_vm0, %v1252_v5 }
 0x207   :  { %1937 = vst.msk [vmem:[%s4892_s1 + $0xc40] sm:$0xff] %vm1544_vm0, %v1247_v6  ;;  %1939 = vst.msk [vmem:[%s4892_s1 + $0xc50] sm:$0xff] %vm1544_vm0, %v1247_v6 }
 0x209   :  { %v1262_v7 = vpop.permute.xlu1 %1261  ;;  %v1257_v8 = vpop.permute.xlu0 %1256 }
 0x20a   :  { %1942 = vst.msk [vmem:[%s4892_s1 + $0xc68] sm:$0xff] %vm1544_vm0, %v1262_v7  ;;  %1944 = vst.msk [vmem:[%s4892_s1 + $0xc78] sm:$0xff] %vm1544_vm0, %v1262_v7 }
 0x20b   :  { %1941 = vst.msk [vmem:[%s4892_s1 + $0xc60] sm:$0xff] %vm1544_vm0, %v1257_v8  ;;  %1943 = vst.msk [vmem:[%s4892_s1 + $0xc70] sm:$0xff] %vm1544_vm0, %v1257_v8 }
 0x20d   :  { %v1272_v9 = vpop.permute.xlu1 %1271  ;;  %v1267_v10 = vpop.permute.xlu0 %1266 }
 0x20e   :  { %1946 = vst.msk [vmem:[%s4892_s1 + $0xc88] sm:$0xff] %vm1544_vm0, %v1272_v9  ;;  %1948 = vst.msk [vmem:[%s4892_s1 + $0xc98] sm:$0xff] %vm1544_vm0, %v1272_v9 }
 0x20f   :  { %1945 = vst.msk [vmem:[%s4892_s1 + $0xc80] sm:$0xff] %vm1544_vm0, %v1267_v10  ;;  %1947 = vst.msk [vmem:[%s4892_s1 + $0xc90] sm:$0xff] %vm1544_vm0, %v1267_v10 }
 0x211   :  { %v1282_v11 = vpop.permute.xlu1 %1281  ;;  %v1277_v12 = vpop.permute.xlu0 %1276 }
 0x212   :  { %1950 = vst.msk [vmem:[%s4892_s1 + $0xca8] sm:$0xff] %vm1544_vm0, %v1282_v11  ;;  %1952 = vst.msk [vmem:[%s4892_s1 + $0xcb8] sm:$0xff] %vm1544_vm0, %v1282_v11 }
 0x213   :  { %1949 = vst.msk [vmem:[%s4892_s1 + $0xca0] sm:$0xff] %vm1544_vm0, %v1277_v12  ;;  %1951 = vst.msk [vmem:[%s4892_s1 + $0xcb0] sm:$0xff] %vm1544_vm0, %v1277_v12 }
 0x215   :  { %v1292_v13 = vpop.permute.xlu1 %1291  ;;  %v1287_v14 = vpop.permute.xlu0 %1286 }
 0x216   :  { %1954 = vst.msk [vmem:[%s4892_s1 + $0xcc8] sm:$0xff] %vm1544_vm0, %v1292_v13  ;;  %1956 = vst.msk [vmem:[%s4892_s1 + $0xcd8] sm:$0xff] %vm1544_vm0, %v1292_v13 }
 0x217   :  { %1953 = vst.msk [vmem:[%s4892_s1 + $0xcc0] sm:$0xff] %vm1544_vm0, %v1287_v14  ;;  %1955 = vst.msk [vmem:[%s4892_s1 + $0xcd0] sm:$0xff] %vm1544_vm0, %v1287_v14 }
 0x219   :  { %v1302_v15 = vpop.permute.xlu1 %1301  ;;  %v1297_v16 = vpop.permute.xlu0 %1296 }
 0x21a   :  { %1958 = vst.msk [vmem:[%s4892_s1 + $0xce8] sm:$0xff] %vm1544_vm0, %v1302_v15  ;;  %1960 = vst.msk [vmem:[%s4892_s1 + $0xcf8] sm:$0xff] %vm1544_vm0, %v1302_v15 }
 0x21b   :  { %1957 = vst.msk [vmem:[%s4892_s1 + $0xce0] sm:$0xff] %vm1544_vm0, %v1297_v16  ;;  %1959 = vst.msk [vmem:[%s4892_s1 + $0xcf0] sm:$0xff] %vm1544_vm0, %v1297_v16 }
 0x21d   :  { %v1312_v17 = vpop.permute.xlu1 %1311  ;;  %v1307_v18 = vpop.permute.xlu0 %1306 }
 0x21e   :  { %1962 = vst.msk [vmem:[%s4892_s1 + $0xd08] sm:$0xff] %vm1544_vm0, %v1312_v17  ;;  %1964 = vst.msk [vmem:[%s4892_s1 + $0xd18] sm:$0xff] %vm1544_vm0, %v1312_v17 }
 0x21f   :  { %1961 = vst.msk [vmem:[%s4892_s1 + $0xd00] sm:$0xff] %vm1544_vm0, %v1307_v18  ;;  %1963 = vst.msk [vmem:[%s4892_s1 + $0xd10] sm:$0xff] %vm1544_vm0, %v1307_v18 }
 0x221   :  { %v1322_v19 = vpop.permute.xlu1 %1321  ;;  %v1317_v20 = vpop.permute.xlu0 %1316 }
 0x222   :  { %1966 = vst.msk [vmem:[%s4892_s1 + $0xd28] sm:$0xff] %vm1544_vm0, %v1322_v19  ;;  %1968 = vst.msk [vmem:[%s4892_s1 + $0xd38] sm:$0xff] %vm1544_vm0, %v1322_v19 }
 0x223   :  { %1965 = vst.msk [vmem:[%s4892_s1 + $0xd20] sm:$0xff] %vm1544_vm0, %v1317_v20  ;;  %1967 = vst.msk [vmem:[%s4892_s1 + $0xd30] sm:$0xff] %vm1544_vm0, %v1317_v20 }
 0x225   :  { %v1332_v21 = vpop.permute.xlu1 %1331  ;;  %v1327_v22 = vpop.permute.xlu0 %1326 }
 0x226   :  { %1970 = vst.msk [vmem:[%s4892_s1 + $0xd48] sm:$0xff] %vm1544_vm0, %v1332_v21  ;;  %1972 = vst.msk [vmem:[%s4892_s1 + $0xd58] sm:$0xff] %vm1544_vm0, %v1332_v21 }
 0x227   :  { %1969 = vst.msk [vmem:[%s4892_s1 + $0xd40] sm:$0xff] %vm1544_vm0, %v1327_v22  ;;  %1971 = vst.msk [vmem:[%s4892_s1 + $0xd50] sm:$0xff] %vm1544_vm0, %v1327_v22 }
 0x229   :  { %v1342_v23 = vpop.permute.xlu1 %1341  ;;  %v1337_v24 = vpop.permute.xlu0 %1336 }
 0x22a   :  { %1974 = vst.msk [vmem:[%s4892_s1 + $0xd68] sm:$0xff] %vm1544_vm0, %v1342_v23  ;;  %1976 = vst.msk [vmem:[%s4892_s1 + $0xd78] sm:$0xff] %vm1544_vm0, %v1342_v23 }
 0x22b   :  { %1973 = vst.msk [vmem:[%s4892_s1 + $0xd60] sm:$0xff] %vm1544_vm0, %v1337_v24  ;;  %1975 = vst.msk [vmem:[%s4892_s1 + $0xd70] sm:$0xff] %vm1544_vm0, %v1337_v24 }
 0x22d   :  { %v1352_v25 = vpop.permute.xlu1 %1351  ;;  %v1347_v26 = vpop.permute.xlu0 %1346 }
 0x22e   :  { %1978 = vst.msk [vmem:[%s4892_s1 + $0xd88] sm:$0xff] %vm1544_vm0, %v1352_v25  ;;  %1980 = vst.msk [vmem:[%s4892_s1 + $0xd98] sm:$0xff] %vm1544_vm0, %v1352_v25 }
 0x22f   :  { %1977 = vst.msk [vmem:[%s4892_s1 + $0xd80] sm:$0xff] %vm1544_vm0, %v1347_v26  ;;  %1979 = vst.msk [vmem:[%s4892_s1 + $0xd90] sm:$0xff] %vm1544_vm0, %v1347_v26 }
 0x231   :  { %v1362_v27 = vpop.permute.xlu1 %1361  ;;  %v1357_v28 = vpop.permute.xlu0 %1356 }
 0x232   :  { %1982 = vst.msk [vmem:[%s4892_s1 + $0xda8] sm:$0xff] %vm1544_vm0, %v1362_v27  ;;  %1984 = vst.msk [vmem:[%s4892_s1 + $0xdb8] sm:$0xff] %vm1544_vm0, %v1362_v27 }
 0x233   :  { %1981 = vst.msk [vmem:[%s4892_s1 + $0xda0] sm:$0xff] %vm1544_vm0, %v1357_v28  ;;  %1983 = vst.msk [vmem:[%s4892_s1 + $0xdb0] sm:$0xff] %vm1544_vm0, %v1357_v28 }
 0x235   :  { %v1372_v29 = vpop.permute.xlu1 %1371  ;;  %v1367_v30 = vpop.permute.xlu0 %1366 }
 0x236   :  { %1986 = vst.msk [vmem:[%s4892_s1 + $0xdc8] sm:$0xff] %vm1544_vm0, %v1372_v29  ;;  %1988 = vst.msk [vmem:[%s4892_s1 + $0xdd8] sm:$0xff] %vm1544_vm0, %v1372_v29 }
 0x237   :  { %1985 = vst.msk [vmem:[%s4892_s1 + $0xdc0] sm:$0xff] %vm1544_vm0, %v1367_v30  ;;  %1987 = vst.msk [vmem:[%s4892_s1 + $0xdd0] sm:$0xff] %vm1544_vm0, %v1367_v30 }
 0x239   :  { %v1382_v31 = vpop.permute.xlu1 %1381  ;;  %v1377_v32 = vpop.permute.xlu0 %1376 }
 0x23a   :  { %1990 = vst.msk [vmem:[%s4892_s1 + $0xde8] sm:$0xff] %vm1544_vm0, %v1382_v31  ;;  %1992 = vst.msk [vmem:[%s4892_s1 + $0xdf8] sm:$0xff] %vm1544_vm0, %v1382_v31 }
 0x23b   :  { %1989 = vst.msk [vmem:[%s4892_s1 + $0xde0] sm:$0xff] %vm1544_vm0, %v1377_v32  ;;  %1991 = vst.msk [vmem:[%s4892_s1 + $0xdf0] sm:$0xff] %vm1544_vm0, %v1377_v32 }
 0x23d   :  { %v1392_v33 = vpop.permute.xlu1 %1391  ;;  %v1387_v34 = vpop.permute.xlu0 %1386 }
 0x23e   :  { %1994 = vst.msk [vmem:[%s4892_s1 + $0xe08] sm:$0xff] %vm1544_vm0, %v1392_v33  ;;  %1996 = vst.msk [vmem:[%s4892_s1 + $0xe18] sm:$0xff] %vm1544_vm0, %v1392_v33 }
 0x23f   :  { %1993 = vst.msk [vmem:[%s4892_s1 + $0xe00] sm:$0xff] %vm1544_vm0, %v1387_v34  ;;  %1995 = vst.msk [vmem:[%s4892_s1 + $0xe10] sm:$0xff] %vm1544_vm0, %v1387_v34 }
 0x241   :  { %v1402_v35 = vpop.permute.xlu1 %1401  ;;  %v1397_v36 = vpop.permute.xlu0 %1396 }
 0x242   :  { %1998 = vst.msk [vmem:[%s4892_s1 + $0xe28] sm:$0xff] %vm1544_vm0, %v1402_v35  ;;  %2000 = vst.msk [vmem:[%s4892_s1 + $0xe38] sm:$0xff] %vm1544_vm0, %v1402_v35 }
 0x243   :  { %1997 = vst.msk [vmem:[%s4892_s1 + $0xe20] sm:$0xff] %vm1544_vm0, %v1397_v36  ;;  %1999 = vst.msk [vmem:[%s4892_s1 + $0xe30] sm:$0xff] %vm1544_vm0, %v1397_v36 }
 0x245   :  { %v1412_v37 = vpop.permute.xlu1 %1411  ;;  %v1407_v38 = vpop.permute.xlu0 %1406 }
 0x246   :  { %2002 = vst.msk [vmem:[%s4892_s1 + $0xe48] sm:$0xff] %vm1544_vm0, %v1412_v37  ;;  %2004 = vst.msk [vmem:[%s4892_s1 + $0xe58] sm:$0xff] %vm1544_vm0, %v1412_v37 }
 0x247   :  { %2001 = vst.msk [vmem:[%s4892_s1 + $0xe40] sm:$0xff] %vm1544_vm0, %v1407_v38  ;;  %2003 = vst.msk [vmem:[%s4892_s1 + $0xe50] sm:$0xff] %vm1544_vm0, %v1407_v38 }
 0x249   :  { %v1422_v39 = vpop.permute.xlu1 %1421  ;;  %v1417_v40 = vpop.permute.xlu0 %1416 }
 0x24a   :  { %2006 = vst.msk [vmem:[%s4892_s1 + $0xe68] sm:$0xff] %vm1544_vm0, %v1422_v39  ;;  %2008 = vst.msk [vmem:[%s4892_s1 + $0xe78] sm:$0xff] %vm1544_vm0, %v1422_v39 }
 0x24b   :  { %2005 = vst.msk [vmem:[%s4892_s1 + $0xe60] sm:$0xff] %vm1544_vm0, %v1417_v40  ;;  %2007 = vst.msk [vmem:[%s4892_s1 + $0xe70] sm:$0xff] %vm1544_vm0, %v1417_v40 }
 0x24d   :  { %v1432_v41 = vpop.permute.xlu1 %1431  ;;  %v1427_v42 = vpop.permute.xlu0 %1426 }
 0x24e   :  { %2010 = vst.msk [vmem:[%s4892_s1 + $0xe88] sm:$0xff] %vm1544_vm0, %v1432_v41  ;;  %2012 = vst.msk [vmem:[%s4892_s1 + $0xe98] sm:$0xff] %vm1544_vm0, %v1432_v41 }
 0x24f   :  { %2009 = vst.msk [vmem:[%s4892_s1 + $0xe80] sm:$0xff] %vm1544_vm0, %v1427_v42  ;;  %2011 = vst.msk [vmem:[%s4892_s1 + $0xe90] sm:$0xff] %vm1544_vm0, %v1427_v42 }
 0x251   :  { %v1442_v43 = vpop.permute.xlu1 %1441  ;;  %v1437_v44 = vpop.permute.xlu0 %1436 }
 0x252   :  { %2014 = vst.msk [vmem:[%s4892_s1 + $0xea8] sm:$0xff] %vm1544_vm0, %v1442_v43  ;;  %2016 = vst.msk [vmem:[%s4892_s1 + $0xeb8] sm:$0xff] %vm1544_vm0, %v1442_v43 }
 0x253   :  { %2013 = vst.msk [vmem:[%s4892_s1 + $0xea0] sm:$0xff] %vm1544_vm0, %v1437_v44  ;;  %2015 = vst.msk [vmem:[%s4892_s1 + $0xeb0] sm:$0xff] %vm1544_vm0, %v1437_v44 }
 0x255   :  { %v1452_v45 = vpop.permute.xlu1 %1451  ;;  %v1447_v46 = vpop.permute.xlu0 %1446 }
 0x256   :  { %2018 = vst.msk [vmem:[%s4892_s1 + $0xec8] sm:$0xff] %vm1544_vm0, %v1452_v45  ;;  %2020 = vst.msk [vmem:[%s4892_s1 + $0xed8] sm:$0xff] %vm1544_vm0, %v1452_v45 }
 0x257   :  { %2017 = vst.msk [vmem:[%s4892_s1 + $0xec0] sm:$0xff] %vm1544_vm0, %v1447_v46  ;;  %2019 = vst.msk [vmem:[%s4892_s1 + $0xed0] sm:$0xff] %vm1544_vm0, %v1447_v46 }
 0x259   :  { %v1462_v47 = vpop.permute.xlu1 %1461  ;;  %v1457_v48 = vpop.permute.xlu0 %1456 }
 0x25a   :  { %2022 = vst.msk [vmem:[%s4892_s1 + $0xee8] sm:$0xff] %vm1544_vm0, %v1462_v47  ;;  %2024 = vst.msk [vmem:[%s4892_s1 + $0xef8] sm:$0xff] %vm1544_vm0, %v1462_v47 }
 0x25b   :  { %2021 = vst.msk [vmem:[%s4892_s1 + $0xee0] sm:$0xff] %vm1544_vm0, %v1457_v48  ;;  %2023 = vst.msk [vmem:[%s4892_s1 + $0xef0] sm:$0xff] %vm1544_vm0, %v1457_v48 }
 0x25d   :  { %v1472_v49 = vpop.permute.xlu1 %1471  ;;  %v1467_v50 = vpop.permute.xlu0 %1466 }
 0x25e   :  { %2026 = vst.msk [vmem:[%s4892_s1 + $0xf08] sm:$0xff] %vm1544_vm0, %v1472_v49  ;;  %2028 = vst.msk [vmem:[%s4892_s1 + $0xf18] sm:$0xff] %vm1544_vm0, %v1472_v49 }
 0x25f   :  { %2025 = vst.msk [vmem:[%s4892_s1 + $0xf00] sm:$0xff] %vm1544_vm0, %v1467_v50  ;;  %2027 = vst.msk [vmem:[%s4892_s1 + $0xf10] sm:$0xff] %vm1544_vm0, %v1467_v50 }
 0x261   :  { %v1482_v51 = vpop.permute.xlu1 %1481  ;;  %v1477_v52 = vpop.permute.xlu0 %1476 }
 0x262   :  { %2030 = vst.msk [vmem:[%s4892_s1 + $0xf28] sm:$0xff] %vm1544_vm0, %v1482_v51  ;;  %2032 = vst.msk [vmem:[%s4892_s1 + $0xf38] sm:$0xff] %vm1544_vm0, %v1482_v51 }
 0x263   :  { %2029 = vst.msk [vmem:[%s4892_s1 + $0xf20] sm:$0xff] %vm1544_vm0, %v1477_v52  ;;  %2031 = vst.msk [vmem:[%s4892_s1 + $0xf30] sm:$0xff] %vm1544_vm0, %v1477_v52 }
 0x265   :  { %v1492_v53 = vpop.permute.xlu1 %1491  ;;  %v1487_v54 = vpop.permute.xlu0 %1486 }
 0x266   :  { %2034 = vst.msk [vmem:[%s4892_s1 + $0xf48] sm:$0xff] %vm1544_vm0, %v1492_v53  ;;  %2036 = vst.msk [vmem:[%s4892_s1 + $0xf58] sm:$0xff] %vm1544_vm0, %v1492_v53 }
 0x267   :  { %2033 = vst.msk [vmem:[%s4892_s1 + $0xf40] sm:$0xff] %vm1544_vm0, %v1487_v54  ;;  %2035 = vst.msk [vmem:[%s4892_s1 + $0xf50] sm:$0xff] %vm1544_vm0, %v1487_v54 }
 0x269   :  { %v1502_v55 = vpop.permute.xlu1 %1501  ;;  %v1497_v56 = vpop.permute.xlu0 %1496 }
 0x26a   :  { %2038 = vst.msk [vmem:[%s4892_s1 + $0xf68] sm:$0xff] %vm1544_vm0, %v1502_v55  ;;  %2040 = vst.msk [vmem:[%s4892_s1 + $0xf78] sm:$0xff] %vm1544_vm0, %v1502_v55 }
 0x26b   :  { %2037 = vst.msk [vmem:[%s4892_s1 + $0xf60] sm:$0xff] %vm1544_vm0, %v1497_v56  ;;  %2039 = vst.msk [vmem:[%s4892_s1 + $0xf70] sm:$0xff] %vm1544_vm0, %v1497_v56 }
 0x26d   :  { %v1512_v57 = vpop.permute.xlu1 %1511  ;;  %v1507_v58 = vpop.permute.xlu0 %1506 }
 0x26e   :  { %2042 = vst.msk [vmem:[%s4892_s1 + $0xf88] sm:$0xff] %vm1544_vm0, %v1512_v57  ;;  %2044 = vst.msk [vmem:[%s4892_s1 + $0xf98] sm:$0xff] %vm1544_vm0, %v1512_v57 }
 0x26f   :  { %2041 = vst.msk [vmem:[%s4892_s1 + $0xf80] sm:$0xff] %vm1544_vm0, %v1507_v58  ;;  %2043 = vst.msk [vmem:[%s4892_s1 + $0xf90] sm:$0xff] %vm1544_vm0, %v1507_v58 }
 0x271   :  { %v1522_v59 = vpop.permute.xlu1 %1521  ;;  %v1517_v60 = vpop.permute.xlu0 %1516 }
 0x272   :  { %2046 = vst.msk [vmem:[%s4892_s1 + $0xfa8] sm:$0xff] %vm1544_vm0, %v1522_v59  ;;  %2048 = vst.msk [vmem:[%s4892_s1 + $0xfb8] sm:$0xff] %vm1544_vm0, %v1522_v59 }
 0x273   :  { %2045 = vst.msk [vmem:[%s4892_s1 + $0xfa0] sm:$0xff] %vm1544_vm0, %v1517_v60  ;;  %2047 = vst.msk [vmem:[%s4892_s1 + $0xfb0] sm:$0xff] %vm1544_vm0, %v1517_v60 }
 0x275   :  { %v1532_v61 = vpop.permute.xlu1 %1531  ;;  %v1527_v62 = vpop.permute.xlu0 %1526 }
 0x276   :  { %2050 = vst.msk [vmem:[%s4892_s1 + $0xfc8] sm:$0xff] %vm1544_vm0, %v1532_v61  ;;  %2052 = vst.msk [vmem:[%s4892_s1 + $0xfd8] sm:$0xff] %vm1544_vm0, %v1532_v61 }
 0x277   :  { %2049 = vst.msk [vmem:[%s4892_s1 + $0xfc0] sm:$0xff] %vm1544_vm0, %v1527_v62  ;;  %2051 = vst.msk [vmem:[%s4892_s1 + $0xfd0] sm:$0xff] %vm1544_vm0, %v1527_v62 }
 0x279   :  { %v1542_v63 = vpop.permute.xlu1 %1541  ;;  %v1537_v0 = vpop.permute.xlu0 %1536 }
 0x27a   :  { %2054 = vst.msk [vmem:[%s4892_s1 + $0xfe8] sm:$0xff] %vm1544_vm0, %v1542_v63  ;;  %2056 = vst.msk [vmem:[%s4892_s1 + $0xff8] sm:$0xff] %vm1544_vm0, %v1542_v63 }
 0x27b   :  { %2053 = vst.msk [vmem:[%s4892_s1 + $0xfe0] sm:$0xff] %vm1544_vm0, %v1537_v0  ;;  %2055 = vst.msk [vmem:[%s4892_s1 + $0xff0] sm:$0xff] %vm1544_vm0, %v1537_v0 }

</bundles_post_ra>
